<compile_context>
chip_gen: v5e
topology: v5e:2x2
jax: 0.10.0
libtpu: 0.0.40
codegen_flags: <defaults>
</compile_context>

<pallas_src>
import functools

import jax
import jax.numpy as jnp
import numpy as np
from jax.experimental import pallas as pl
from jax.experimental.pallas import tpu as pltpu


def _round_up(a, b):
    return (a + b - 1) // b * b


# ---------------------------------------------------------------------------
# Kernel 1: temporal conv (bf16 MXU, f32 acc) + fused BN partial statistics.
# ---------------------------------------------------------------------------
def _conv_bn_kernel(x_ref, w_ref, y_ref, s_ref, *, K, stride, dilation, TT, T_out, need_mask):
    # x_ref: (T_in, NV_tile, Cin) bf16   (full padded time extent, one NV tile)
    # w_ref: (K, Cin, Cout) bf16
    # y_ref: (TT, NV_tile, Cout) f32     (one block of output time steps)
    # s_ref: (1, 2, Cout) f32            (per-block [sum, sum_sq] partials)
    t_i = pl.program_id(1)
    nv_t = x_ref.shape[1]
    cin = x_ref.shape[2]
    cout = w_ref.shape[2]

    t0 = t_i * (TT * stride)
    if (TT * stride) % 8 == 0:
        t0 = pl.multiple_of(t0, 8)

    acc = jnp.zeros((TT * nv_t, cout), jnp.float32)
    for k in range(K):  # K is a small static unroll
        start = t0 + k * dilation
        if stride == 1:
            xs = x_ref[pl.ds(start, TT)]                 # (TT, NV_t, Cin)
        else:
            xs = x_ref[pl.ds(start, TT, stride)]         # strided time gather
        acc = acc + jnp.dot(xs.reshape(TT * nv_t, cin), w_ref[k],
                            preferred_element_type=jnp.float32)

    y = acc.reshape(TT, nv_t, cout)
    y_ref[...] = y

    # BN partial statistics for this block.  Padded time rows (t >= T_out) are masked out;
    # padded NV rows are exactly zero (zero input, no bias) so they contribute nothing.
    if need_mask:
        tloc = jax.lax.broadcasted_iota(jnp.int32, (TT, 1, 1), 0)
        y = jnp.where(t_i * TT + tloc < T_out, y, 0.0)
    s_ref[:, 0:1, :] = jnp.sum(y, axis=(0, 1), keepdims=True)
    s_ref[:, 1:2, :] = jnp.sum(y * y, axis=(0, 1), keepdims=True)


# ---------------------------------------------------------------------------
# Kernel 2: BN apply (elementwise scale + shift, f32, output aliased onto y).
# ---------------------------------------------------------------------------
def _bn_apply_kernel(y_ref, scale_ref, shift_ref, o_ref):
    # y_ref/o_ref: (TT, NV, Cout);  scale_ref/shift_ref: (1, 1, Cout)
    o_ref[...] = y_ref[...] * scale_ref[...] + shift_ref[...]


def temporal_conv_bn(x, w, b, gamma, beta, *, kernel_size, stride=1, dilation=1,
                     eps=1e-5, block_t=8, nv_tile=None):
    """Forward of TemporalConv.  x: (N, C_in, T, V) NCHW.  Returns (N, C_out, T_out, V).

    b (the conv bias) is accepted for API parity but unused: adding a per-channel constant
    before training-mode BatchNorm is exactly cancelled by the mean subtraction.
    """
    del b
    N, Cin, T, V = x.shape
    Cout = w.shape[0]
    K = kernel_size
    pad = (K + (K - 1) * (dilation - 1) - 1) // 2
    eff = (K - 1) * dilation + 1
    T_out = (T + 2 * pad - eff) // stride + 1
    NV = N * V

    # ---- tiling choices ------------------------------------------------------
    TT = max(1, min(block_t, T_out))
    t_blocks = pl.cdiv(T_out, TT)
    T_out_pad = t_blocks * TT
    need_mask = T_out_pad != T_out

    if nv_tile is None:
        nv_tile = NV if NV <= 512 else 256          # keep v7x VMEM happy at large shapes
    if nv_tile >= NV:
        nv_tile, NV_pad = NV, NV
    else:
        nv_tile = max(8, (nv_tile // 8) * 8)
        NV_pad = _round_up(NV, nv_tile)
    nv_blocks = NV_pad // nv_tile

    # ---- glue: NCHW -> (T_in, NV_pad, Cin), bf16 matmul operands -------------
    x32 = x.astype(jnp.float32)
    T_in_need = (T_out_pad - 1) * stride + eff
    extra = max(0, T_in_need - (T + 2 * pad))
    x_padded = jnp.pad(x32, ((0, 0), (0, 0), (pad, pad + extra), (0, 0)))
    T_in = T + 2 * pad + extra
    xk = jnp.transpose(x_padded, (2, 0, 3, 1)).reshape(T_in, NV, Cin)
    if NV_pad > NV:
        xk = jnp.pad(xk, ((0, 0), (0, NV_pad - NV), (0, 0)))
    xk = xk.astype(jnp.bfloat16)
    wk = jnp.transpose(w, (2, 1, 0)).astype(jnp.bfloat16)            # (K, Cin, Cout)

    # ---- conv + fused BN partial stats ---------------------------------------
    conv_kern = functools.partial(_conv_bn_kernel, K=K, stride=stride, dilation=dilation,
                                  TT=TT, T_out=T_out, need_mask=need_mask)
    y, part = pl.pallas_call(
        conv_kern,
        out_shape=(jax.ShapeDtypeStruct((T_out_pad, NV_pad, Cout), jnp.float32),
                   jax.ShapeDtypeStruct((nv_blocks * t_blocks, 2, Cout), jnp.float32)),
        grid=(nv_blocks, t_blocks),
        in_specs=[
            pl.BlockSpec((T_in, nv_tile, Cin), lambda nv, t: (0, nv, 0)),
            pl.BlockSpec((K, Cin, Cout), lambda nv, t: (0, 0, 0)),
        ],
        out_specs=[
            pl.BlockSpec((TT, nv_tile, Cout), lambda nv, t: (t, nv, 0)),
            pl.BlockSpec((1, 2, Cout), lambda nv, t: (nv * t_blocks + t, 0, 0)),
        ],
        compiler_params=pltpu.CompilerParams(dimension_semantics=("parallel", "parallel")),
    )(xk, wk)

    # ---- BN statistics -> scale/shift (tiny host-side math, f32) -------------
    # NOTE: E[y^2]-E[y]^2 can cancel for channels with mean >> std; acceptable here since
    # conv outputs of normalized activations are near zero-mean.
    sums = jnp.sum(part, axis=0)                    # (2, Cout)
    cnt = jnp.float32(T_out * NV)                   # = N * T_out * V elements per channel
    mean = sums[0] / cnt
    var = jnp.maximum(sums[1] / cnt - mean * mean, 0.0)   # biased variance (training BN)
    inv_std = jax.lax.rsqrt(var + eps)
    g32 = gamma.astype(jnp.float32)
    scale = (g32 * inv_std).reshape(1, 1, Cout)
    shift = (beta.astype(jnp.float32) - mean * g32 * inv_std).reshape(1, 1, Cout)

    # ---- BN apply (memory-bound; output aliased onto y) ----------------------
    z = pl.pallas_call(
        _bn_apply_kernel,
        out_shape=jax.ShapeDtypeStruct((T_out_pad, NV_pad, Cout), jnp.float32),
        grid=(t_blocks,),
        in_specs=[
            pl.BlockSpec((TT, NV_pad, Cout), lambda i: (i, 0, 0)),
            pl.BlockSpec((1, 1, Cout), lambda i: (0, 0, 0)),
            pl.BlockSpec((1, 1, Cout), lambda i: (0, 0, 0)),
        ],
        out_specs=pl.BlockSpec((TT, NV_pad, Cout), lambda i: (i, 0, 0)),
        input_output_aliases={0: 0},
        compiler_params=pltpu.CompilerParams(dimension_semantics=("parallel",)),
    )(y, scale, shift)

    # ---- glue: back to NCHW ---------------------------------------------------
    z = z[:T_out, :NV]
    return z.reshape(T_out, N, V, Cout).transpose(1, 3, 0, 2)


# ---------------------------------------------------------------------------
# Pure-JAX reference for verification (conv + bias + training-mode BN).
# ---------------------------------------------------------------------------
def _reference(x, w, b, gamma, beta, *, kernel_size, stride, dilation, eps=1e-5):
    N, Cin, T, V = x.shape
    Cout = w.shape[0]
    K = kernel_size
    pad = (K + (K - 1) * (dilation - 1) - 1) // 2
    eff = (K - 1) * dilation + 1
    T_pad = T + 2 * pad
    T_out = (T_pad - eff) // stride + 1
    x_pad = jnp.pad(x, ((0, 0), (0, 0), (pad, pad), (0, 0)))
    y = jnp.zeros((N, Cout, T_out, V), jnp.float32)
    for k in range(K):
        start = k * dilation
        xs = x_pad[:, :, start:start + (T_out - 1) * stride + 1:stride, :]
        y = y + jnp.einsum('nctv,oc->notv', xs, w[:, :, k])
    y = y + b[None, :, None, None]
    mean = y.mean(axis=(0, 2, 3), keepdims=True)
    var = ((y - mean) ** 2).mean(axis=(0, 2, 3), keepdims=True)
    return (y - mean) / jnp.sqrt(var + eps) * gamma[None, :, None, None] + beta[None, :, None, None]


if __name__ == "__main__":
    key = jax.random.PRNGKey(0)
    k_x, k_w, k_b, k_g, k_be = jax.random.split(key, 5)

    # Small, module-consistent shapes: (N, C_in, T, V) = (2, 4, 16, 5)
    N, Cin, T, V = 2, 4, 16, 5
    Cout, K, stride, dilation = 8, 3, 1, 1

    x = jax.random.normal(k_x, (N, Cin, T, V), dtype=jnp.float32)
    # Conv2d weight shape in PyTorch is (Cout, Cin, K, 1); the trailing 1 is dropped.
    w = jax.random.normal(k_w, (Cout, Cin, K), dtype=jnp.float32) * 0.1
    b = jax.random.normal(k_b, (Cout,), dtype=jnp.float32) * 0.1
    gamma = 1.0 + 0.1 * jax.random.normal(k_g, (Cout,), dtype=jnp.float32)
    beta = 0.1 * jax.random.normal(k_be, (Cout,), dtype=jnp.float32)

    # Quantize matmul inputs to bf16 once so the bf16-MXU kernel and the f32 reference see
    # identical values; the remaining delta is only f32 accumulation order.
    xq = x.astype(jnp.bfloat16).astype(jnp.float32)
    wq = w.astype(jnp.bfloat16).astype(jnp.float32)

    fwd = jax.jit(functools.partial(temporal_conv_bn, kernel_size=K,
                                    stride=stride, dilation=dilation))
    out = jax.block_until_ready(fwd(xq, wq, b, gamma, beta))

    ref = _reference(xq, wq, b, gamma, beta,
                     kernel_size=K, stride=stride, dilation=dilation)
    np.testing.assert_allclose(np.asarray(out), np.asarray(ref), rtol=1e-3, atol=1e-3)

    print("KERNEL_OK")
</pallas_src>

<mosaic_0001>
module attributes {stable_mosaic.version = 11 : i64} {
  func.func @_bn_apply_kernel(%arg0: i32, %arg1: memref<8x10x8xf32, #tpu.memory_space<vmem>>, %arg2: memref<1x1x8xf32, #tpu.memory_space<vmem>>, %arg3: memref<1x1x8xf32, #tpu.memory_space<vmem>>, %arg4: memref<8x10x8xf32, #tpu.memory_space<vmem>>) attributes {dimension_semantics = [#tpu.dimension_semantics<parallel>], iteration_bounds = array<i64: 2>, scalar_prefetch = 0 : i64, scratch_operands = 0 : i64, tpu.core_type = #tpu.core_type<tc>, window_params = [{transform_indices = @transform_0, window_bounds = array<i64: 8, 10, 8>}, {pipeline_mode = #tpu.pipeline_mode<synchronous>, transform_indices = @transform_1, window_bounds = array<i64: 1, 1, 8>}, {pipeline_mode = #tpu.pipeline_mode<synchronous>, transform_indices = @transform_2, window_bounds = array<i64: 1, 1, 8>}, {transform_indices = @transform_3, window_bounds = array<i64: 8, 10, 8>}]} {
    %c0 = arith.constant 0 : index
    %c0_0 = arith.constant 0 : index
    %c0_1 = arith.constant 0 : index
    %0 = vector.load %arg1[%c0, %c0_0, %c0_1] : memref<8x10x8xf32, #tpu.memory_space<vmem>>, vector<8x10x8xf32>
    %c0_2 = arith.constant 0 : index
    %c0_3 = arith.constant 0 : index
    %c0_4 = arith.constant 0 : index
    %1 = vector.load %arg2[%c0_2, %c0_3, %c0_4] : memref<1x1x8xf32, #tpu.memory_space<vmem>>, vector<1x1x8xf32>
    %2 = vector.broadcast %1 : vector<1x1x8xf32> to vector<8x10x8xf32>
    %3 = arith.mulf %0, %2 : vector<8x10x8xf32>
    %c0_5 = arith.constant 0 : index
    %c0_6 = arith.constant 0 : index
    %c0_7 = arith.constant 0 : index
    %4 = vector.load %arg3[%c0_5, %c0_6, %c0_7] : memref<1x1x8xf32, #tpu.memory_space<vmem>>, vector<1x1x8xf32>
    %5 = vector.broadcast %4 : vector<1x1x8xf32> to vector<8x10x8xf32>
    %6 = arith.addf %3, %5 : vector<8x10x8xf32>
    %c0_8 = arith.constant 0 : index
    %c0_9 = arith.constant 0 : index
    %c0_10 = arith.constant 0 : index
    %7 = vector.load %arg4[%c0_8, %c0_9, %c0_10] : memref<8x10x8xf32, #tpu.memory_space<vmem>>, vector<8x10x8xf32>
    tpu.vector_store %arg4[%c0_8, %c0_9, %c0_10], %6 {strides = array<i32>} : memref<8x10x8xf32, #tpu.memory_space<vmem>>, vector<8x10x8xf32>,
    return
  }
  func.func @transform_0(%arg0: i32) -> (i32, i32, i32) {
    %c0_i32 = arith.constant 0 : i32
    %c0_i32_0 = arith.constant 0 : i32
    %c0_i32_1 = arith.constant 0 : i32
    return %arg0, %c0_i32, %c0_i32_0 : i32, i32, i32
  }
  func.func @transform_1(%arg0: i32) -> (i32, i32, i32) {
    %c0_i32 = arith.constant 0 : i32
    %c0_i32_0 = arith.constant 0 : i32
    %c0_i32_1 = arith.constant 0 : i32
    %c0_i32_2 = arith.constant 0 : i32
    return %c0_i32, %c0_i32_0, %c0_i32_1 : i32, i32, i32
  }
  func.func @transform_2(%arg0: i32) -> (i32, i32, i32) {
    %c0_i32 = arith.constant 0 : i32
    %c0_i32_0 = arith.constant 0 : i32
    %c0_i32_1 = arith.constant 0 : i32
    %c0_i32_2 = arith.constant 0 : i32
    return %c0_i32, %c0_i32_0, %c0_i32_1 : i32, i32, i32
  }
  func.func @transform_3(%arg0: i32) -> (i32, i32, i32) {
    %c0_i32 = arith.constant 0 : i32
    %c0_i32_0 = arith.constant 0 : i32
    %c0_i32_1 = arith.constant 0 : i32
    return %arg0, %c0_i32, %c0_i32_0 : i32, i32, i32
  }
}

module attributes {stable_mosaic.version = 11 : i64} {
  func.func @_conv_bn_kernel(%arg0: i32, %arg1: i32, %arg2: memref<18x10x4xbf16, #tpu.memory_space<vmem>>, %arg3: memref<3x4x8xbf16, #tpu.memory_space<vmem>>, %arg4: memref<8x10x8xf32, #tpu.memory_space<vmem>>, %arg5: memref<1x2x8xf32, #tpu.memory_space<vmem>>) attributes {dimension_semantics = [#tpu.dimension_semantics<parallel>, #tpu.dimension_semantics<parallel>], iteration_bounds = array<i64: 1, 2>, scalar_prefetch = 0 : i64, scratch_operands = 0 : i64, tpu.core_type = #tpu.core_type<tc>, window_params = [{transform_indices = @transform_0, window_bounds = array<i64: 18, 10, 4>}, {pipeline_mode = #tpu.pipeline_mode<synchronous>, transform_indices = @transform_1, window_bounds = array<i64: 3, 4, 8>}, {transform_indices = @transform_2, window_bounds = array<i64: 8, 10, 8>}, {transform_indices = @transform_3, window_bounds = array<i64: 1, 2, 8>}]} {
    %c8_i32 = arith.constant 8 : i32
    %0 = arith.muli %arg1, %c8_i32 : i32
    %1 = tpu.assume_multiple %0, 8 : i32
    %cst = arith.constant 0.000000e+00 : f32
    %2 = vector.broadcast %cst : f32 to vector<80x8xf32>
    %c0_i32 = arith.constant 0 : i32
    %3 = arith.addi %1, %c0_i32 : i32
    %4 = arith.index_cast %3 : i32 to index
    %c0 = arith.constant 0 : index
    %c0_0 = arith.constant 0 : index
    %5 = vector.load %arg2[%4, %c0, %c0_0] : memref<18x10x4xbf16, #tpu.memory_space<vmem>>, vector<8x10x4xbf16>
    %6 = vector.shape_cast %5 : vector<8x10x4xbf16> to vector<80x4xbf16>
    %c0_1 = arith.constant 0 : index
    %c0_2 = arith.constant 0 : index
    %c0_3 = arith.constant 0 : index
    %7 = vector.load %arg3[%c0_1, %c0_2, %c0_3] : memref<3x4x8xbf16, #tpu.memory_space<vmem>>, vector<1x4x8xbf16>
    %8 = vector.shape_cast %7 : vector<1x4x8xbf16> to vector<4x8xbf16>
    %cst_4 = arith.constant dense<0.000000e+00> : vector<80x8xf32>
    %9 = tpu.matmul %6, %8, %cst_4 {dimension_numbers = #tpu.dot_dimension_numbers<[1], [0], [0], [1], [0, 0, 1, 1], [], []>} : vector<80x4xbf16>, vector<4x8xbf16>, vector<80x8xf32> -> vector<80x8xf32>
    %10 = arith.addf %2, %9 : vector<80x8xf32>
    %c1_i32 = arith.constant 1 : i32
    %11 = arith.addi %1, %c1_i32 : i32
    %12 = arith.index_cast %11 : i32 to index
    %c0_5 = arith.constant 0 : index
    %c0_6 = arith.constant 0 : index
    %13 = vector.load %arg2[%12, %c0_5, %c0_6] : memref<18x10x4xbf16, #tpu.memory_space<vmem>>, vector<8x10x4xbf16>
    %14 = vector.shape_cast %13 : vector<8x10x4xbf16> to vector<80x4xbf16>
    %c1 = arith.constant 1 : index
    %c0_7 = arith.constant 0 : index
    %c0_8 = arith.constant 0 : index
    %15 = vector.load %arg3[%c1, %c0_7, %c0_8] : memref<3x4x8xbf16, #tpu.memory_space<vmem>>, vector<1x4x8xbf16>
    %16 = vector.shape_cast %15 : vector<1x4x8xbf16> to vector<4x8xbf16>
    %cst_9 = arith.constant dense<0.000000e+00> : vector<80x8xf32>
    %17 = tpu.matmul %14, %16, %cst_9 {dimension_numbers = #tpu.dot_dimension_numbers<[1], [0], [0], [1], [0, 0, 1, 1], [], []>} : vector<80x4xbf16>, vector<4x8xbf16>, vector<80x8xf32> -> vector<80x8xf32>
    %18 = arith.addf %10, %17 : vector<80x8xf32>
    %c2_i32 = arith.constant 2 : i32
    %19 = arith.addi %1, %c2_i32 : i32
    %20 = arith.index_cast %19 : i32 to index
    %c0_10 = arith.constant 0 : index
    %c0_11 = arith.constant 0 : index
    %21 = vector.load %arg2[%20, %c0_10, %c0_11] : memref<18x10x4xbf16, #tpu.memory_space<vmem>>, vector<8x10x4xbf16>
    %22 = vector.shape_cast %21 : vector<8x10x4xbf16> to vector<80x4xbf16>
    %c2 = arith.constant 2 : index
    %c0_12 = arith.constant 0 : index
    %c0_13 = arith.constant 0 : index
    %23 = vector.load %arg3[%c2, %c0_12, %c0_13] : memref<3x4x8xbf16, #tpu.memory_space<vmem>>, vector<1x4x8xbf16>
    %24 = vector.shape_cast %23 : vector<1x4x8xbf16> to vector<4x8xbf16>
    %cst_14 = arith.constant dense<0.000000e+00> : vector<80x8xf32>
    %25 = tpu.matmul %22, %24, %cst_14 {dimension_numbers = #tpu.dot_dimension_numbers<[1], [0], [0], [1], [0, 0, 1, 1], [], []>} : vector<80x4xbf16>, vector<4x8xbf16>, vector<80x8xf32> -> vector<80x8xf32>
    %26 = arith.addf %18, %25 : vector<80x8xf32>
    %27 = vector.shape_cast %26 : vector<80x8xf32> to vector<8x10x8xf32>
    %c0_15 = arith.constant 0 : index
    %c0_16 = arith.constant 0 : index
    %c0_17 = arith.constant 0 : index
    %28 = vector.load %arg4[%c0_15, %c0_16, %c0_17] : memref<8x10x8xf32, #tpu.memory_space<vmem>>, vector<8x10x8xf32>
    tpu.vector_store %arg4[%c0_15, %c0_16, %c0_17], %27 {strides = array<i32>} : memref<8x10x8xf32, #tpu.memory_space<vmem>>, vector<8x10x8xf32>,
    %cst_18 = arith.constant dense<0.000000e+00> : vector<8xf32>
    %29 = vector.multi_reduction <add>, %27, %cst_18 [0, 1] : vector<8x10x8xf32> to vector<8xf32>
    %30 = vector.shape_cast %29 : vector<8xf32> to vector<1x1x8xf32>
    %c0_19 = arith.constant 0 : index
    %c0_20 = arith.constant 0 : index
    %c0_21 = arith.constant 0 : index
    %31 = vector.load %arg5[%c0_19, %c0_20, %c0_21] : memref<1x2x8xf32, #tpu.memory_space<vmem>>, vector<1x1x8xf32>
    tpu.vector_store %arg5[%c0_19, %c0_20, %c0_21], %30 {strides = array<i32>} : memref<1x2x8xf32, #tpu.memory_space<vmem>>, vector<1x1x8xf32>,
    %32 = arith.mulf %27, %27 : vector<8x10x8xf32>
    %cst_22 = arith.constant dense<0.000000e+00> : vector<8xf32>
    %33 = vector.multi_reduction <add>, %32, %cst_22 [0, 1] : vector<8x10x8xf32> to vector<8xf32>
    %34 = vector.shape_cast %33 : vector<8xf32> to vector<1x1x8xf32>
    %c0_23 = arith.constant 0 : index
    %c1_24 = arith.constant 1 : index
    %c0_25 = arith.constant 0 : index
    %35 = vector.load %arg5[%c0_23, %c1_24, %c0_25] : memref<1x2x8xf32, #tpu.memory_space<vmem>>, vector<1x1x8xf32>
    tpu.vector_store %arg5[%c0_23, %c1_24, %c0_25], %34 {strides = array<i32>} : memref<1x2x8xf32, #tpu.memory_space<vmem>>, vector<1x1x8xf32>,
    return
  }
  func.func @transform_0(%arg0: i32, %arg1: i32) -> (i32, i32, i32) {
    %c0_i32 = arith.constant 0 : i32
    %c0_i32_0 = arith.constant 0 : i32
    %c0_i32_1 = arith.constant 0 : i32
    return %c0_i32, %arg0, %c0_i32_0 : i32, i32, i32
  }
  func.func @transform_1(%arg0: i32, %arg1: i32) -> (i32, i32, i32) {
    %c0_i32 = arith.constant 0 : i32
    %c0_i32_0 = arith.constant 0 : i32
    %c0_i32_1 = arith.constant 0 : i32
    %c0_i32_2 = arith.constant 0 : i32
    return %c0_i32, %c0_i32_0, %c0_i32_1 : i32, i32, i32
  }
  func.func @transform_2(%arg0: i32, %arg1: i32) -> (i32, i32, i32) {
    %c0_i32 = arith.constant 0 : i32
    %c0_i32_0 = arith.constant 0 : i32
    return %arg1, %arg0, %c0_i32 : i32, i32, i32
  }
  func.func @transform_3(%arg0: i32, %arg1: i32) -> (i32, i32, i32) {
    %c2_i32 = arith.constant 2 : i32
    %0 = arith.muli %arg0, %c2_i32 : i32
    %1 = arith.addi %0, %arg1 : i32
    %c0_i32 = arith.constant 0 : i32
    %c0_i32_0 = arith.constant 0 : i32
    %c0_i32_1 = arith.constant 0 : i32
    return %1, %c0_i32, %c0_i32_0 : i32, i32, i32
  }
}

</mosaic_0001>

<bundles_post_ra>
// kernel: temporal_conv_bn.3
= control target key start
LH: loop header
LB: loop body
LE: loop exit
PB: predicated region body
PF: predicated region fallthrough
CT: control target
= control target key end

     0   :  { %s364_s12 = smov 0   ;;  %s421_s0 = inlined_call_operand.vmem [shape: f32[16,10,8], index: 0, kind: input, shape index: {}, may-alias: {0,3}]   ;;  %s422_s1 = inlined_call_operand.vmem [shape: f32[1,1,8], index: 1, kind: input, shape index: {}]   ;;  %s423_s2 = inlined_call_operand.vmem [shape: f32[1,1,8], index: 2, kind: input, shape index: {}]   ;;  %s424_s3 = inlined_call_operand.vmem [shape: f32[16,10,8], index: 3, kind: output, shape index: {}, may-alias: {0,3}]  }
   0x1 LB: > { %s311_s13 = sadd.s32 4294967295, %s342_s12   ;;  %p315_p0 = scmp.ge.s32.totalorder %s342_s12, 1  ;;  %s342_s12 = sphi %s364_s12, %s13_s12  }
   0x2   : > { %p139_p1 = scmp.lt.s32.totalorder %s342_s12, 3 }
   0x4   : > { %p140_p2 = pnand %p315_p0, %p139_p1 }
   0x5   : > { %s316_s14 = sshll.u32 (!%p140_p2), %s311_s13, 3 }
   0x6   : > { %143 = sbr.rel (%p140_p2) target bundleno = 36 (0x24), region = 32  ;;  %p166_p3 = scmp.lt.s32.totalorder (!%p140_p2), %s316_s14, 15 }
   0xb   : > { %s426_s14 = smov (!%p166_p3, %s316_s14), 15  ;;  %v334_v0 = vld [vmem:[%s422_s1] ss:$0 sm:$0xff]  ;;  %vm235_vm0 = vcmask 64512   ;;  %vm237_vm1 = vcmask 58368  }
   0xc   : > { %s324_s17 = sshll.u32 %s426_s14, 4  ;;  %v335_v1 = vld [vmem:[%s423_s2] ss:$0 sm:$0xff] }
   0xd   : > { %s170_s20 = scalar_lea.vmem %s421_s0, %s324_s17  ;;  %s384_s25 = scalar_lea.vmem %s424_s3, %s324_s17 }
   0xe   : > { %v179_v2 = vld [vmem:[%s170_s20] sm:$0xff]  ;;  %v181_v3 = vld [vmem:[%s170_s20 + $0x10] sm:$0xff]  ;;  %v180_v4 = vld [vmem:[%s170_s20 + $0x8] sm:$0x3] }
   0xf   : > { %v183_v5 = vld [vmem:[%s170_s20 + $0x20] sm:$0xff]  ;;  %v199_v6 = vmul.f32 %v334_v0, %v179_v2  ;;  %v201_v7 = vmul.f32 %v334_v0, %v181_v3  ;;  %v182_v8 = vld [vmem:[%s170_s20 + $0x18] sm:$0x3]  ;;  %v185_v9 = vld [vmem:[%s170_s20 + $0x30] sm:$0xff]  ;;  %v200_v28 = vmul.f32 %v334_v0, %v180_v4 }
  0x10   : > { %v187_v10 = vld [vmem:[%s170_s20 + $0x40] sm:$0xff]  ;;  %v203_v11 = vmul.f32 %v334_v0, %v183_v5  ;;  %v184_v12 = vld [vmem:[%s170_s20 + $0x28] sm:$0x3]  ;;  %v186_v13 = vld [vmem:[%s170_s20 + $0x38] sm:$0x3]  ;;  %v205_v15 = vmul.f32 %v334_v0, %v185_v9  ;;  %v202_v30 = vmul.f32 %v334_v0, %v182_v8 }
  0x11   : > { %v189_v14 = vld [vmem:[%s170_s20 + $0x50] sm:$0xff]  ;;  %v207_v16 = vmul.f32 %v334_v0, %v187_v10  ;;  %v219_v17 = vadd.f32 %v335_v1, %v199_v6  ;;  %v188_v18 = vld [vmem:[%s170_s20 + $0x48] sm:$0x3]  ;;  %v191_v19 = vld [vmem:[%s170_s20 + $0x60] sm:$0xff]  ;;  %v221_v27 = vadd.f32 %v335_v1, %v201_v7  ;;  %v204_v33 = vmul.f32 %v334_v0, %v184_v12 }
  0x12   : > { %v193_v20 = vld [vmem:[%s170_s20 + $0x70] sm:$0xff]  ;;  %v209_v21 = vmul.f32 %v334_v0, %v189_v14  ;;  %v190_v22 = vld [vmem:[%s170_s20 + $0x58] sm:$0x3]  ;;  %v192_v23 = vld [vmem:[%s170_s20 + $0x68] sm:$0x3]  ;;  %v211_v25 = vmul.f32 %v334_v0, %v191_v19  ;;  %v223_v29 = vadd.f32 %v335_v1, %v203_v11  ;;  %v225_v31 = vadd.f32 %v335_v1, %v205_v15 }
  0x13   : > { %v194_v24 = vld [vmem:[%s170_s20 + $0x78] sm:$0x3]  ;;  %v213_v26 = vmul.f32 %v334_v0, %v193_v20  ;;  %v227_v32 = vadd.f32 %v335_v1, %v207_v16  ;;  %v206_v36 = vmul.f32 %v334_v0, %v186_v13  ;;  %v208_v38 = vmul.f32 %v334_v0, %v188_v18 }
  0x14   : > { %236 = vst.msk [vmem:[%s384_s25] sm:$0xff] %vm235_vm0, %v219_v17  ;;  %v229_v34 = vadd.f32 %v335_v1, %v209_v21  ;;  %v231_v35 = vadd.f32 %v335_v1, %v211_v25  ;;  %v220_v39 = vadd.f32 %v335_v1, %v200_v28  ;;  %v210_v40 = vmul.f32 %v334_v0, %v190_v22 }
  0x15   : > { %239 = vst.msk [vmem:[%s384_s25 + $0x10] sm:$0xff] %vm235_vm0, %v221_v27  ;;  %v233_v37 = vadd.f32 %v335_v1, %v213_v26  ;;  %v222_v41 = vadd.f32 %v335_v1, %v202_v30  ;;  %v212_v42 = vmul.f32 %v334_v0, %v192_v23  ;;  %v224_v43 = vadd.f32 %v335_v1, %v204_v33 }
  0x16   : > { %241 = vst.msk [vmem:[%s384_s25 + $0x20] sm:$0xff] %vm235_vm0, %v223_v29  ;;  %v214_v44 = vmul.f32 %v334_v0, %v194_v24  ;;  %v226_v45 = vadd.f32 %v335_v1, %v206_v36  ;;  %v228_v46 = vadd.f32 %v335_v1, %v208_v38  ;;  %v230_v47 = vadd.f32 %v335_v1, %v210_v40 }
  0x17   : > { %243 = vst.msk [vmem:[%s384_s25 + $0x30] sm:$0xff] %vm235_vm0, %v225_v31  ;;  %v232_v48 = vadd.f32 %v335_v1, %v212_v42 }
  0x18   : > { %245 = vst.msk [vmem:[%s384_s25 + $0x40] sm:$0xff] %vm235_vm0, %v227_v32  ;;  %v234_v49 = vadd.f32 %v335_v1, %v214_v44 }
  0x19   : > { %247 = vst.msk [vmem:[%s384_s25 + $0x50] sm:$0xff] %vm235_vm0, %v229_v34 }
  0x1a   : > { %249 = vst.msk [vmem:[%s384_s25 + $0x60] sm:$0xff] %vm235_vm0, %v231_v35 }
  0x1b   : > { %251 = vst.msk [vmem:[%s384_s25 + $0x70] sm:$0xff] %vm235_vm0, %v233_v37 }
  0x1c   : > { %238 = vst.msk [vmem:[%s384_s25 + $0x8] sm:$0x3] %vm237_vm1, %v220_v39 }
  0x1d   : > { %240 = vst.msk [vmem:[%s384_s25 + $0x18] sm:$0x3] %vm237_vm1, %v222_v41 }
  0x1e   : > { %242 = vst.msk [vmem:[%s384_s25 + $0x28] sm:$0x3] %vm237_vm1, %v224_v43 }
  0x1f   : > { %244 = vst.msk [vmem:[%s384_s25 + $0x38] sm:$0x3] %vm237_vm1, %v226_v45 }
  0x20   : > { %246 = vst.msk [vmem:[%s384_s25 + $0x48] sm:$0x3] %vm237_vm1, %v228_v46 }
  0x21   : > { %248 = vst.msk [vmem:[%s384_s25 + $0x58] sm:$0x3] %vm237_vm1, %v230_v47 }
  0x22   : > { %250 = vst.msk [vmem:[%s384_s25 + $0x68] sm:$0x3] %vm237_vm1, %v232_v48 }
  0x23   : > { %252 = vst.msk [vmem:[%s384_s25 + $0x78] sm:$0x3] %vm237_vm1, %v234_v49 }
  0x24 PF: > { %s13_s12 = sadd.s32 1, %s342_s12  }
  0x25   : > { %p10_p4 = scmp.ge.s32.totalorder %s13_s12, 4  }
  0x27   :  { %12 = sbr.rel (!%p10_p4) target bundleno = 1 (0x1), region = 62 }

// kernel: temporal_conv_bn.2
= control target key start
LH: loop header
LB: loop body
LE: loop exit
PB: predicated region body
PF: predicated region fallthrough
CT: control target
= control target key end

     0   :  { %s1877_s12 = smov 0   ;;  %s1879_s13 = smov 0   ;;  %s2458_s0 = inlined_call_operand.vmem [shape: bf16[18,10,4], index: 0, kind: input, shape index: {}]   ;;  %s2459_s1 = inlined_call_operand.vmem [shape: bf16[3,4,8], index: 1, kind: input, shape index: {}]   ;;  %s2460_s2 = inlined_call_operand.vmem [shape: f32[16,10,8], index: 2, kind: output, shape index: {0}]   ;;  %s2461_s3 = inlined_call_operand.vmem [shape: f32[2,2,8], index: 3, kind: output, shape index: {1}]  }
   0x1   :  { %s1881_s14 = smov 0  }
   0x2 LB: > { %s23_s15 = sadd.s32 1, %s1851_s13  ;;  %p1738_p0 = scmp.ge.s32.totalorder %s1855_s14, 1  ;;  %s1855_s14 = sphi %s1881_s14, %s14_s14   ;;  %s1851_s13 = sphi %s1879_s13, %s2463_s13   ;;  %s1847_s12 = sphi %s1877_s12, %s2462_s12  }
   0x3   : > { %p24_p1 = scmp.ge.s32.totalorder %s23_s15, 2  ;;  %p159_p2 = scmp.lt.s32.totalorder %s1855_s14, 3 }
   0x5   : > { %s2465_s15 = smov (%p24_p1, %s23_s15), 0  ;;  %p160_p3 = pnand %p1738_p0, %p159_p2 }
   0x6   : > { %s1803_s18 = sshll.u32 (!%p160_p3), %s1847_s12, 6  ;;  %s1739_s26 = sshll.u32 (!%p160_p3), %s1847_s12, 3 }
   0x7   : > { %163 = sbr.rel (%p160_p3) target bundleno = 612 (0x264), region = 28  ;;  %s1905_s21 = scalar_lea.vmem (!%p160_p3), %s2458_s0, %s1803_s18 }
   0x8   : > { %p202_p4 = scmp.lt.s32.totalorder (!%p160_p3), %s1739_s26, 15  ;;  %p214_p5 = scmp.lt.s32.totalorder (!%p160_p3), %s1847_s12, 1 }
   0xc   : > { %v1764_v0 = vld [vmem:[%s2459_s1 + $0x2] sm:$0x3]  ;;  %vm659_vm0 = vcmask 1041408   ;;  %vm273_vm1 = vcmask 1040384   ;;  %vm277_vm2 = vcmask 1041409   ;;  %vm281_vm3 = vcmask 1042434  }
   0xd   : > { %v661_v1 = vsel %vm659_vm0, %v1764_v0, 0  ;;  %vm285_vm4 = vcmask 1043459   ;;  %v397_v2 = vld [vmem:[%s2459_s1] sm:$0x3]  ;;  %v1748_v3 = vld [vmem:[%s1905_s21 + $0x8] sm:$0xf] }
   0xe   : > { %670 = vmatpush.bf16.msra.mxu0 %v661_v1  ;;  %v1749_v4 = vld [vmem:[%s1905_s21 + $0xc] sm:$0x1]  ;;  %v1750_v5 = vld [vmem:[%s1905_s21 + $0x10] sm:$0xf]  ;;  %1806 = vmatpush.bf16.msra.mxu3 %v661_v1  ;;  %v434_v6 = vrot.slane %v1748_v3, 3  ;;  %v784_v9 = vsel %vm659_vm0, %v397_v2, 0 }
   0xf   : > { %v435_v7 = vrot.slane %v1749_v4, 3  ;;  %v436_v8 = vrot.slane %v1750_v5, 3  ;;  %1807 = vmatpush.bf16.msra.mxu1 %v784_v9  ;;  %v1752_v23 = vld [vmem:[%s1905_s21 + $0x18] sm:$0xf]  ;;  %v1751_v24 = vld [vmem:[%s1905_s21 + $0x14] sm:$0x1] }
  0x10   : > { %v452_v10 = vsel %vm273_vm1, %v1748_v3, %v434_v6  ;;  %v453_v11 = vsel %vm277_vm2, %v1748_v3, %v434_v6  ;;  %v456_v12 = vsel %vm281_vm3, %v1748_v3, %v434_v6  ;;  %v459_v13 = vsel %vm285_vm4, %v1748_v3, %v434_v6  ;;  %v1753_v28 = vld [vmem:[%s1905_s21 + $0x1c] sm:$0x1]  ;;  %v1754_v30 = vld [vmem:[%s1905_s21 + $0x20] sm:$0xf]  ;;  %v1756_v44 = vld [vmem:[%s1905_s21 + $0x28] sm:$0xf] }
  0x11   : > { %v455_v14 = vrot.slane %v453_v11, 1  ;;  %v458_v15 = vrot.slane %v456_v12, 2  ;;  %v461_v16 = vrot.slane %v459_v13, 3  ;;  %v464_v17 = vsel %vm273_vm1, %v1749_v4, %v435_v7  ;;  %572 = vst [vmem:[#allocation1] ss:$9 sm:$0xff] %v452_v10  ;;  %s2467_s26 = smov (!%p202_p4, %s1739_s26), 15 }
  0x12   : > { %793 = vmatpush.bf16.msrb.mxu0 %v784_v9  ;;  %v468_v18 = vsel %vm277_vm2, %v1750_v5, %v436_v8  ;;  %v471_v19 = vsel %vm281_vm3, %v1750_v5, %v436_v8  ;;  %583 = vst [vmem:[#allocation1 + $0x4] ss:$9 sm:$0xff] %v464_v17  ;;  %v467_v20 = vsel %vm273_vm1, %v1750_v5, %v436_v8  ;;  %v438_v25 = vrot.slane %v1752_v23, 3  ;;  %v1755_v45 = vld [vmem:[%s1905_s21 + $0x24] sm:$0x1]  ;;  %s1801_s27 = sshll.u32 %s2467_s26, 4 }
  0x13   : > { %v470_v21 = vrot.slane %v468_v18, 1  ;;  %575 = vst [vmem:[#allocation1 + $0x1] ss:$9 sm:$0xff] %v455_v14  ;;  %v473_v22 = vrot.slane %v471_v19, 2  ;;  %v474_v26 = vsel %vm285_vm4, %v1750_v5, %v436_v8  ;;  %v437_v27 = vrot.slane %v1751_v24, 3  ;;  %s2130_s30 = scalar_lea.vmem %s2460_s2, %s1801_s27  ;;  %s2469_s12 = smov (!%p214_p5, %s1847_s12), 1 }
  0x14   : > { %578 = vst [vmem:[#allocation1 + $0x2] ss:$9 sm:$0xff] %v458_v15  ;;  %v476_v29 = vrot.slane %v474_v26, 3  ;;  %vm648_vm5 = vcmask 31744   ;;  %v483_v31 = vsel %vm277_vm2, %v1752_v23, %v438_v25  ;;  %v486_v32 = vsel %vm281_vm3, %v1752_v23, %v438_v25  ;;  %v1758_v62 = vld [vmem:[%s1905_s21 + $0x30] sm:$0xf] }
  0x15   : > { %581 = vst [vmem:[#allocation1 + $0x3] ss:$9 sm:$0xff] %v461_v16  ;;  %v479_v33 = vsel %vm273_vm1, %v1751_v24, %v437_v27  ;;  %v489_v34 = vsel %vm285_vm4, %v1752_v23, %v438_v25  ;;  %v439_v36 = vrot.slane %v1753_v28, 3  ;;  %v482_v37 = vsel %vm273_vm1, %v1752_v23, %v438_v25  ;;  %v1757_v0 = vld [vmem:[%s1905_s21 + $0x2c] sm:$0x1]  ;;  %s1742_s4 = sshll.u32 %s2469_s12, 1 }
  0x16   : > { %585 = vst [vmem:[#allocation1 + $0x5] ss:$9 sm:$0xff] %v467_v20  ;;  %v485_v38 = vrot.slane %v483_v31, 1  ;;  %v440_v39 = vrot.slane %v1754_v30, 3  ;;  %v488_v40 = vrot.slane %v486_v32, 2  ;;  %v491_v41 = vrot.slane %v489_v34, 3  ;;  %s2367_s7 = scalar_lea.vmem %s2461_s3, %s1742_s4 }
  0x17   : > { %588 = vst [vmem:[#allocation1 + $0x6] ss:$9 sm:$0xff] %v470_v21  ;;  %v494_v42 = vsel %vm273_vm1, %v1753_v28, %v439_v36  ;;  %v442_v47 = vrot.slane %v1756_v44, 3  ;;  %v441_v50 = vrot.slane %v1755_v45, 3  ;;  %v444_v1 = vrot.slane %v1758_v62, 3 }
  0x18   : > { %591 = vst [vmem:[#allocation1 + $0x7] ss:$9 sm:$0xff] %v473_v22  ;;  %v497_v43 = vsel %vm273_vm1, %v1754_v30, %v440_v39  ;;  %v498_v46 = vsel %vm277_vm2, %v1754_v30, %v440_v39  ;;  %v501_v48 = vsel %vm281_vm3, %v1754_v30, %v440_v39  ;;  %v504_v49 = vsel %vm285_vm4, %v1754_v30, %v440_v39  ;;  %v1760_v2 = vld [vmem:[%s1905_s21 + $0x38] sm:$0xf]  ;;  %v1759_v4 = vld [vmem:[%s1905_s21 + $0x34] sm:$0x1] }
  0x19   : > { %v500_v51 = vrot.slane %v498_v46, 1  ;;  %v503_v52 = vrot.slane %v501_v48, 2  ;;  %v506_v53 = vrot.slane %v504_v49, 3  ;;  %v513_v54 = vsel %vm277_vm2, %v1756_v44, %v442_v47  ;;  %v1762_v20 = vld [vmem:[%s1905_s21 + $0x40] sm:$0xf] }
  0x1a   : > { %v516_v55 = vsel %vm281_vm3, %v1756_v44, %v442_v47  ;;  %v509_v57 = vsel %vm273_vm1, %v1755_v45, %v441_v50  ;;  %v519_v58 = vsel %vm285_vm4, %v1756_v44, %v442_v47  ;;  %v512_v59 = vsel %vm273_vm1, %v1756_v44, %v442_v47  ;;  %v1761_v21 = vld [vmem:[%s1905_s21 + $0x3c] sm:$0x1]  ;;  %v1763_v27 = vld [vmem:[%s1905_s21 + $0x44] sm:$0x1]  ;;  %v227_v44 = vld [vmem:[%s1905_s21 + $0x8] sm:$0xf] }
  0x1b   : > { %v515_v60 = vrot.slane %v513_v54, 1  ;;  %v518_v61 = vrot.slane %v516_v55, 2  ;;  %v521_v63 = vrot.slane %v519_v58, 3  ;;  %v443_v3 = vrot.slane %v1757_v0, 3  ;;  %v1793_v31 = vld [vmem:[%s2459_s1 + $0x4] sm:$0x3] }
  0x1c   : > { %v528_v5 = vsel %vm277_vm2, %v1758_v62, %v444_v1  ;;  %v446_v6 = vrot.slane %v1760_v2, 3  ;;  %v531_v7 = vsel %vm281_vm3, %v1758_v62, %v444_v1  ;;  %v534_v9 = vsel %vm285_vm4, %v1758_v62, %v444_v1  ;;  %v226_v45 = vld [vmem:[%s1905_s21 + $0x4] sm:$0x1] }
  0x1d   : > { %v524_v8 = vsel %vm273_vm1, %v1757_v0, %v443_v3  ;;  %v445_v10 = vrot.slane %v1759_v4, 3  ;;  %v527_v11 = vsel %vm273_vm1, %v1758_v62, %v444_v1  ;;  %v530_v12 = vrot.slane %v528_v5, 1  ;;  %v229_v62 = vld [vmem:[%s1905_s21 + $0x10] sm:$0xf]  ;;  %v230_v3 = vld [vmem:[%s1905_s21 + $0x14] sm:$0x1] }
  0x1e   : > { %v533_v13 = vrot.slane %v531_v7, 2  ;;  %v536_v15 = vrot.slane %v534_v9, 3  ;;  %v543_v16 = vsel %vm277_vm2, %v1760_v2, %v446_v6  ;;  %v542_v18 = vsel %vm273_vm1, %v1760_v2, %v446_v6 }
  0x1f   : > { %v592_v35 = vld [vmem:[#allocation1] sm:$0xff]  ;;  %v539_v17 = vsel %vm273_vm1, %v1759_v4, %v445_v10  ;;  %v545_v19 = vrot.slane %v543_v16, 1  ;;  %v448_v22 = vrot.slane %v1762_v20, 3  ;;  %v546_v23 = vsel %vm281_vm3, %v1760_v2, %v446_v6 }
  0x20   : > { %1765 = vmatmul.msk.bf16.vlgmr.msra.gmra.mxu0 %vm648_vm5, %v592_v35  ;;  %594 = vst [vmem:[#allocation1] ss:$9 sm:$0xff] %v476_v29  ;;  %v549_v24 = vsel %vm285_vm4, %v1760_v2, %v446_v6  ;;  %v447_v25 = vrot.slane %v1761_v21, 3  ;;  %v548_v26 = vrot.slane %v546_v23, 2  ;;  %v1081_v35 = vsel %vm659_vm0, %v1793_v31, 0 }
  0x21   : > { %595 = vst [vmem:[#allocation1 + $0x1] ss:$9 sm:$0xff] %v479_v33  ;;  %v551_v28 = vrot.slane %v549_v24, 3  ;;  %v558_v29 = vsel %vm277_vm2, %v1762_v20, %v448_v22  ;;  %v561_v30 = vsel %vm281_vm3, %v1762_v20, %v448_v22  ;;  %v564_v33 = vsel %vm285_vm4, %v1762_v20, %v448_v22  ;;  %1090 = vmatpush.bf16.msra.mxu0 %v1081_v35  ;;  %v231_v6 = vld [vmem:[%s1905_s21 + $0x18] sm:$0xf] }
  0x22   : > { %596 = vst [vmem:[#allocation1 + $0x2] ss:$9 sm:$0xff] %v482_v37  ;;  %v554_v32 = vsel %vm273_vm1, %v1761_v21, %v447_v25  ;;  %v449_v36 = vrot.slane %v1763_v27, 3  ;;  %v557_v37 = vsel %vm273_vm1, %v1762_v20, %v448_v22  ;;  %1808 = vmatpush.bf16.msra.mxu2 %v1081_v35  ;;  %v563_v39 = vrot.slane %v561_v30, 2  ;;  %v232_v20 = vld [vmem:[%s1905_s21 + $0x1c] sm:$0x1] }
  0x23   : > { %598 = vst [vmem:[#allocation1 + $0x3] ss:$9 sm:$0xff] %v485_v38  ;;  %v560_v38 = vrot.slane %v558_v29, 1  ;;  %v259_v47 = vrot.slane %v227_v44, 3  ;;  %v258_v50 = vrot.slane %v226_v45, 3  ;;  %v261_v0 = vrot.slane %v229_v62, 3 }
  0x24   : > { %600 = vst [vmem:[#allocation1 + $0x4] ss:$9 sm:$0xff] %v488_v40  ;;  %v225_v40 = vld [vmem:[%s1905_s21] sm:$0xf]  ;;  %v264_v25 = vrot.slane %v232_v20, 3  ;;  %vm1273_vm6 = vcmask 64512  }
  0x25   : > { %602 = vst [vmem:[#allocation1 + $0x5] ss:$9 sm:$0xff] %v491_v41  ;;  %v566_v41 = vrot.slane %v564_v33, 3  ;;  %v295_v55 = vsel %vm277_vm2, %v227_v44, %v259_v47  ;;  %v291_v58 = vsel %vm273_vm1, %v226_v45, %v258_v50  ;;  %v301_v1 = vsel %vm285_vm4, %v227_v44, %v259_v47 }
  0x26   : > { %603 = vst [vmem:[#allocation1 + $0x6] ss:$9 sm:$0xff] %v494_v42  ;;  %v569_v42 = vsel %vm273_vm1, %v1763_v27, %v449_v36  ;;  %v303_v4 = vrot.slane %v301_v1, 3  ;;  %v310_v5 = vsel %vm277_vm2, %v229_v62, %v261_v0  ;;  %v313_v7 = vsel %vm281_vm3, %v229_v62, %v261_v0 }
  0x27   : > { %604 = vst [vmem:[#allocation1 + $0x7] ss:$9 sm:$0xff] %v497_v43  ;;  %v257_v43 = vrot.slane %v225_v40, 3  ;;  %v316_v9 = vsel %vm285_vm4, %v229_v62, %v261_v0  ;;  %vm1275_vm7 = vcmask 58368   ;;  %vm1404_vm8 = vcmask 57344  }
  0x28   : > { %v318_v16 = vrot.slane %v316_v9, 3 }
  0x29   : > { %v278_v46 = vsel %vm277_vm2, %v225_v40, %v257_v43  ;;  %v282_v48 = vsel %vm281_vm3, %v225_v40, %v257_v43  ;;  %v286_v49 = vsel %vm285_vm4, %v225_v40, %v257_v43 }
  0x2a   : > { %v288_v54 = vrot.slane %v286_v49, 3 }
  0x2e   : > { %v605_v56 = vld [vmem:[#allocation1] sm:$0xff] }
  0x2f   : > { %607 = vst [vmem:[#allocation1] ss:$9 sm:$0xff] %v500_v51  ;;  %1766 = vmatmul.msk.bf16.vlgmr.msra.gmra.mxu3 %vm648_vm5, %v605_v56  ;;  %v276_v51 = vsel %vm273_vm1, %v225_v40, %v257_v43  ;;  %v236_v43 = vld [vmem:[%s1905_s21 + $0x2c] sm:$0x1] }
  0x30   : > { %609 = vst [vmem:[#allocation1 + $0x1] ss:$9 sm:$0xff] %v503_v52  ;;  %v280_v52 = vrot.slane %v278_v46, 1  ;;  %v268_v49 = vrot.slane %v236_v43, 3 }
  0x31   : > { %611 = vst [vmem:[#allocation1 + $0x2] ss:$9 sm:$0xff] %v506_v53  ;;  %v284_v53 = vrot.slane %v282_v48, 2 }
  0x32   : > { %612 = vst [vmem:[#allocation1 + $0x3] ss:$9 sm:$0xff] %v509_v57  ;;  %v298_v57 = vsel %vm281_vm3, %v227_v44, %v259_v47 }
  0x33   : > { %613 = vst [vmem:[#allocation1 + $0x4] ss:$9 sm:$0xff] %v512_v59  ;;  %v294_v59 = vsel %vm273_vm1, %v227_v44, %v259_v47 }
  0x34   : > { %615 = vst [vmem:[#allocation1 + $0x5] ss:$9 sm:$0xff] %v515_v60  ;;  %v297_v60 = vrot.slane %v295_v55, 1 }
  0x35   : > { %617 = vst [vmem:[#allocation1 + $0x6] ss:$9 sm:$0xff] %v518_v61  ;;  %v300_v61 = vrot.slane %v298_v57, 2 }
  0x36   : > { %619 = vst [vmem:[#allocation1 + $0x7] ss:$9 sm:$0xff] %v521_v63  ;;  %v228_v63 = vld [vmem:[%s1905_s21 + $0xc] sm:$0x1] }
  0x37   : > { %v260_v2 = vrot.slane %v228_v63, 3 }
  0x3d   : > { %v620_v14 = vld [vmem:[#allocation1] sm:$0xff] }
  0x3e   : > { %621 = vst [vmem:[#allocation1] ss:$9 sm:$0xff] %v524_v8  ;;  %v306_v8 = vsel %vm273_vm1, %v228_v63, %v260_v2  ;;  %v240_v2 = vld [vmem:[%s1905_s21 + $0x3c] sm:$0x1] }
  0x3f   : > { %622 = vst [vmem:[#allocation1 + $0x1] ss:$9 sm:$0xff] %v527_v11  ;;  %1767 = vmatmul.msk.bf16.gmra.mxu3 %vm648_vm5, %v620_v14  ;;  %v262_v11 = vrot.slane %v230_v3, 3  ;;  %v263_v14 = vrot.slane %v231_v6, 3  ;;  %v272_v9 = vrot.slane %v240_v2, 3 }
  0x40   : > { %624 = vst [vmem:[#allocation1 + $0x2] ss:$9 sm:$0xff] %v530_v12  ;;  %v309_v12 = vsel %vm273_vm1, %v229_v62, %v261_v0 }
  0x41   : > { %626 = vst [vmem:[#allocation1 + $0x3] ss:$9 sm:$0xff] %v533_v13  ;;  %v312_v13 = vrot.slane %v310_v5, 1  ;;  %v325_v21 = vsel %vm277_vm2, %v231_v6, %v263_v14  ;;  %v328_v23 = vsel %vm281_vm3, %v231_v6, %v263_v14  ;;  %v331_v24 = vsel %vm285_vm4, %v231_v6, %v263_v14 }
  0x42   : > { %628 = vst [vmem:[#allocation1 + $0x4] ss:$9 sm:$0xff] %v536_v15  ;;  %v315_v15 = vrot.slane %v313_v7, 2  ;;  %v330_v27 = vrot.slane %v328_v23, 2 }
  0x43   : > { %629 = vst [vmem:[#allocation1 + $0x5] ss:$9 sm:$0xff] %v539_v17  ;;  %v321_v17 = vsel %vm273_vm1, %v230_v3, %v262_v11 }
  0x44   : > { %630 = vst [vmem:[#allocation1 + $0x6] ss:$9 sm:$0xff] %v542_v18  ;;  %v324_v18 = vsel %vm273_vm1, %v231_v6, %v263_v14  ;;  %v1777_v14 = vld [vmem:[%s1905_s21 + $0x10] sm:$0xf] }
  0x45   : > { %632 = vst [vmem:[#allocation1 + $0x7] ss:$9 sm:$0xff] %v545_v19  ;;  %v233_v19 = vld [vmem:[%s1905_s21 + $0x20] sm:$0xf] }
  0x46   : > { %v265_v22 = vrot.slane %v233_v19, 3 }
  0x48   : > { %v340_v29 = vsel %vm277_vm2, %v233_v19, %v265_v22  ;;  %v343_v30 = vsel %vm281_vm3, %v233_v19, %v265_v22  ;;  %v346_v33 = vsel %vm285_vm4, %v233_v19, %v265_v22 }
  0x49   : > { %v342_v35 = vrot.slane %v340_v29, 1  ;;  %v345_v36 = vrot.slane %v343_v30, 2 }
  0x4c   : > { %v633_v34 = vld [vmem:[#allocation1] sm:$0xff] }
  0x4d   : > { %635 = vst [vmem:[#allocation1] ss:$9 sm:$0xff] %v548_v26  ;;  %v327_v26 = vrot.slane %v325_v21, 1 }
  0x4e   : > { %637 = vst [vmem:[#allocation1 + $0x1] ss:$9 sm:$0xff] %v551_v28  ;;  %v333_v28 = vrot.slane %v331_v24, 3 }
  0x4f   : > { %638 = vst [vmem:[#allocation1 + $0x2] ss:$9 sm:$0xff] %v554_v32  ;;  %1768 = vmatmul.msk.bf16.gmra.mxu3 %vm648_vm5, %v633_v34  ;;  %v336_v32 = vsel %vm273_vm1, %v232_v20, %v264_v25  ;;  %v339_v34 = vsel %vm273_vm1, %v233_v19, %v265_v22 }
  0x50   : > { %639 = vst [vmem:[#allocation1 + $0x3] ss:$9 sm:$0xff] %v557_v37  ;;  %v235_v37 = vld [vmem:[%s1905_s21 + $0x28] sm:$0xf] }
  0x51   : > { %641 = vst [vmem:[#allocation1 + $0x4] ss:$9 sm:$0xff] %v560_v38  ;;  %v348_v38 = vrot.slane %v346_v33, 3  ;;  %v267_v40 = vrot.slane %v235_v37, 3 }
  0x52   : > { %643 = vst [vmem:[#allocation1 + $0x5] ss:$9 sm:$0xff] %v563_v39  ;;  %v234_v39 = vld [vmem:[%s1905_s21 + $0x24] sm:$0x1] }
  0x53   : > { %645 = vst [vmem:[#allocation1 + $0x6] ss:$9 sm:$0xff] %v566_v41  ;;  %v237_v41 = vld [vmem:[%s1905_s21 + $0x30] sm:$0xf]  ;;  %v355_v44 = vsel %vm277_vm2, %v235_v37, %v267_v40  ;;  %v358_v46 = vsel %vm281_vm3, %v235_v37, %v267_v40  ;;  %v361_v48 = vsel %vm285_vm4, %v235_v37, %v267_v40  ;;  %v354_v50 = vsel %vm273_vm1, %v235_v37, %v267_v40  ;;  %v1782_v40 = vld [vmem:[%s1905_s21 + $0x24] sm:$0x1] }
  0x54   : > { %646 = vst [vmem:[#allocation1 + $0x7] ss:$9 sm:$0xff] %v569_v42  ;;  %v266_v42 = vrot.slane %v234_v39, 3  ;;  %v269_v45 = vrot.slane %v237_v41, 3 }
  0x56   : > { %v351_v47 = vsel %vm273_vm1, %v234_v39, %v266_v42  ;;  %v370_v55 = vsel %vm277_vm2, %v237_v41, %v269_v45  ;;  %v369_v57 = vsel %vm273_vm1, %v237_v41, %v269_v45  ;;  %v373_v62 = vsel %vm281_vm3, %v237_v41, %v269_v45 }
  0x57   : > { %v376_v63 = vsel %vm285_vm4, %v237_v41, %v269_v45  ;;  %v375_v1 = vrot.slane %v373_v62, 2 }
  0x58   : > { %v378_v3 = vrot.slane %v376_v63, 3 }
  0x5b   : > { %v647_v56 = vld [vmem:[#allocation1] sm:$0xff] }
  0x5c   : > { %697 = vst [vmem:[#allocation1] ss:$9 sm:$0xff] %v276_v51  ;;  %v357_v51 = vrot.slane %v355_v44, 1 }
  0x5d   : > { %700 = vst [vmem:[#allocation1 + $0x1] ss:$9 sm:$0xff] %v280_v52  ;;  %v360_v52 = vrot.slane %v358_v46, 2 }
  0x5e   : > { %703 = vst [vmem:[#allocation1 + $0x2] ss:$9 sm:$0xff] %v284_v53 }
  0x5f   : > { %706 = vst [vmem:[#allocation1 + $0x3] ss:$9 sm:$0xff] %v288_v54  ;;  %1769 = vmatmul.msk.bf16.gmra.mxu3 %vm648_vm5, %v647_v56  ;;  %v363_v54 = vrot.slane %v361_v48, 3  ;;  %v366_v56 = vsel %vm273_vm1, %v236_v43, %v268_v49  ;;  %v1783_v43 = vld [vmem:[%s1905_s21 + $0x28] sm:$0xf]  ;;  %v861_v48 = vrot.slane %v1782_v40, 3 }
  0x60   : > { %708 = vst [vmem:[#allocation1 + $0x4] ss:$9 sm:$0xff] %v291_v58  ;;  %v372_v58 = vrot.slane %v370_v55, 1 }
  0x61   : > { %710 = vst [vmem:[#allocation1 + $0x5] ss:$9 sm:$0xff] %v294_v59  ;;  %v239_v59 = vld [vmem:[%s1905_s21 + $0x38] sm:$0xf] }
  0x62   : > { %713 = vst [vmem:[#allocation1 + $0x6] ss:$9 sm:$0xff] %v297_v60  ;;  %v238_v60 = vld [vmem:[%s1905_s21 + $0x34] sm:$0x1] }
  0x63   : > { %716 = vst [vmem:[#allocation1 + $0x7] ss:$9 sm:$0xff] %v300_v61  ;;  %v271_v61 = vrot.slane %v239_v59, 3  ;;  %v270_v0 = vrot.slane %v238_v60, 3 }
  0x65   : > { %v388_v5 = vsel %vm281_vm3, %v239_v59, %v271_v61  ;;  %v381_v6 = vsel %vm273_vm1, %v238_v60, %v270_v0  ;;  %v391_v7 = vsel %vm285_vm4, %v239_v59, %v271_v61 }
  0x6a   : > { %v717_v10 = vld [vmem:[#allocation1] sm:$0xff] }
  0x6b   : > { %1770 = vmatmul.msk.bf16.vlgmr.msrb.gmra.mxu0 %vm648_vm5, %v717_v10  ;;  %719 = vst [vmem:[#allocation1] ss:$9 sm:$0xff] %v303_v4  ;;  %v385_v4 = vsel %vm277_vm2, %v239_v59, %v271_v61  ;;  %v384_v10 = vsel %vm273_vm1, %v239_v59, %v271_v61 }
  0x6c   : > { %720 = vst [vmem:[#allocation1 + $0x1] ss:$9 sm:$0xff] %v306_v8  ;;  %v387_v11 = vrot.slane %v385_v4, 1 }
  0x6d   : > { %721 = vst [vmem:[#allocation1 + $0x2] ss:$9 sm:$0xff] %v309_v12  ;;  %v390_v12 = vrot.slane %v388_v5, 2 }
  0x6e   : > { %723 = vst [vmem:[#allocation1 + $0x3] ss:$9 sm:$0xff] %v312_v13  ;;  %v393_v13 = vrot.slane %v391_v7, 3 }
  0x6f   : > { %725 = vst [vmem:[#allocation1 + $0x4] ss:$9 sm:$0xff] %v315_v15  ;;  %v396_v15 = vsel %vm273_vm1, %v240_v2, %v272_v9 }
  0x70   : > { %727 = vst [vmem:[#allocation1 + $0x5] ss:$9 sm:$0xff] %v318_v16  ;;  %v856_v16 = vrot.slane %v1777_v14, 3 }
  0x71   : > { %728 = vst [vmem:[#allocation1 + $0x6] ss:$9 sm:$0xff] %v321_v17  ;;  %v1779_v17 = vld [vmem:[%s1905_s21 + $0x18] sm:$0xf] }
  0x72   : > { %729 = vst [vmem:[#allocation1 + $0x7] ss:$9 sm:$0xff] %v324_v18  ;;  %v1778_v18 = vld [vmem:[%s1905_s21 + $0x14] sm:$0x1]  ;;  %v875_v19 = vsel %vm277_vm2, %v1777_v14, %v856_v16  ;;  %v858_v20 = vrot.slane %v1779_v17, 3  ;;  %v878_v21 = vsel %vm281_vm3, %v1777_v14, %v856_v16  ;;  %v881_v22 = vsel %vm285_vm4, %v1777_v14, %v856_v16 }
  0x73   : > { %v857_v23 = vrot.slane %v1778_v18, 3  ;;  %v874_v24 = vsel %vm273_vm1, %v1777_v14, %v856_v16  ;;  %v877_v25 = vrot.slane %v875_v19, 1  ;;  %v1789_v14 = vld [vmem:[%s1905_s21 + $0x40] sm:$0xf]  ;;  %v1788_v16 = vld [vmem:[%s1905_s21 + $0x3c] sm:$0x1] }
  0x74   : > { %v890_v29 = vsel %vm277_vm2, %v1779_v17, %v858_v20  ;;  %v893_v30 = vsel %vm281_vm3, %v1779_v17, %v858_v20 }
  0x75   : > { %v892_v33 = vrot.slane %v890_v29, 1 }
  0x79   : > { %v730_v31 = vld [vmem:[#allocation1] sm:$0xff] }
  0x7a   : > { %732 = vst [vmem:[#allocation1] ss:$9 sm:$0xff] %v327_v26  ;;  %1771 = vmatmul.msk.bf16.vlgmr.msra.gmra.mxu1 %vm648_vm5, %v730_v31  ;;  %v880_v26 = vrot.slane %v878_v21, 2  ;;  %v886_v31 = vsel %vm273_vm1, %v1778_v18, %v857_v23  ;;  %v868_v18 = vrot.slane %v1789_v14, 3 }
  0x7b   : > { %734 = vst [vmem:[#allocation1 + $0x1] ss:$9 sm:$0xff] %v330_v27 }
  0x7c   : > { %736 = vst [vmem:[#allocation1 + $0x2] ss:$9 sm:$0xff] %v333_v28  ;;  %v883_v28 = vrot.slane %v881_v22, 3  ;;  %v867_v22 = vrot.slane %v1788_v16, 3 }
  0x7d   : > { %737 = vst [vmem:[#allocation1 + $0x3] ss:$9 sm:$0xff] %v336_v32  ;;  %v889_v32 = vsel %vm273_vm1, %v1779_v17, %v858_v20 }
  0x7e   : > { %738 = vst [vmem:[#allocation1 + $0x4] ss:$9 sm:$0xff] %v339_v34  ;;  %v895_v34 = vrot.slane %v893_v30, 2  ;;  %v961_v29 = vsel %vm273_vm1, %v1788_v16, %v867_v22  ;;  %v964_v30 = vsel %vm273_vm1, %v1789_v14, %v868_v18 }
  0x7f   : > { %740 = vst [vmem:[#allocation1 + $0x5] ss:$9 sm:$0xff] %v342_v35  ;;  %v1781_v35 = vld [vmem:[%s1905_s21 + $0x20] sm:$0xf] }
  0x80   : > { %742 = vst [vmem:[#allocation1 + $0x6] ss:$9 sm:$0xff] %v345_v36  ;;  %v1780_v36 = vld [vmem:[%s1905_s21 + $0x1c] sm:$0x1]  ;;  %v860_v37 = vrot.slane %v1781_v35, 3 }
  0x81   : > { %744 = vst [vmem:[#allocation1 + $0x7] ss:$9 sm:$0xff] %v348_v38  ;;  %v896_v38 = vsel %vm285_vm4, %v1779_v17, %v858_v20  ;;  %v859_v39 = vrot.slane %v1780_v36, 3 }
  0x82   : > { %v898_v41 = vrot.slane %v896_v38, 3  ;;  %v905_v42 = vsel %vm277_vm2, %v1781_v35, %v860_v37  ;;  %v908_v44 = vsel %vm281_vm3, %v1781_v35, %v860_v37  ;;  %v911_v46 = vsel %vm285_vm4, %v1781_v35, %v860_v37 }
  0x83   : > { %v901_v45 = vsel %vm273_vm1, %v1780_v36, %v859_v39  ;;  %v904_v49 = vsel %vm273_vm1, %v1781_v35, %v860_v37  ;;  %v968_v35 = vsel %vm281_vm3, %v1789_v14, %v868_v18  ;;  %v971_v36 = vsel %vm285_vm4, %v1789_v14, %v868_v18  ;;  %v1792_v39 = vld [vmem:[%s1905_s21 + $0x4c] sm:$0x1] }
  0x84   : > { %v970_v38 = vrot.slane %v968_v35, 2 }
  0x88   : > { %v745_v53 = vld [vmem:[#allocation1] sm:$0xff] }
  0x89   : > { %746 = vst [vmem:[#allocation1] ss:$9 sm:$0xff] %v351_v47 }
  0x8a   : > { %747 = vst [vmem:[#allocation1 + $0x1] ss:$9 sm:$0xff] %v354_v50  ;;  %1772 = vmatmul.msk.bf16.gmra.mxu1 %vm648_vm5, %v745_v53  ;;  %v907_v50 = vrot.slane %v905_v42, 1  ;;  %v913_v53 = vrot.slane %v911_v46, 3  ;;  %v871_v46 = vrot.slane %v1792_v39, 3 }
  0x8b   : > { %749 = vst [vmem:[#allocation1 + $0x2] ss:$9 sm:$0xff] %v357_v51  ;;  %v862_v51 = vrot.slane %v1783_v43, 3 }
  0x8c   : > { %751 = vst [vmem:[#allocation1 + $0x3] ss:$9 sm:$0xff] %v360_v52  ;;  %v910_v52 = vrot.slane %v908_v44, 2 }
  0x8d   : > { %753 = vst [vmem:[#allocation1 + $0x4] ss:$9 sm:$0xff] %v363_v54  ;;  %v916_v54 = vsel %vm273_vm1, %v1782_v40, %v861_v48  ;;  %v919_v55 = vsel %vm273_vm1, %v1783_v43, %v862_v51  ;;  %v923_v60 = vsel %vm281_vm3, %v1783_v43, %v862_v51  ;;  %v926_v61 = vsel %vm285_vm4, %v1783_v43, %v862_v51 }
  0x8e   : > { %754 = vst [vmem:[#allocation1 + $0x5] ss:$9 sm:$0xff] %v366_v56  ;;  %v1785_v56 = vld [vmem:[%s1905_s21 + $0x30] sm:$0xf]  ;;  %v925_v0 = vrot.slane %v923_v60, 2  ;;  %v973_v40 = vrot.slane %v971_v36, 3 }
  0x8f   : > { %755 = vst [vmem:[#allocation1 + $0x6] ss:$9 sm:$0xff] %v369_v57  ;;  %v1784_v57 = vld [vmem:[%s1905_s21 + $0x2c] sm:$0x1]  ;;  %v864_v59 = vrot.slane %v1785_v56, 3 }
  0x90   : > { %757 = vst [vmem:[#allocation1 + $0x7] ss:$9 sm:$0xff] %v372_v58  ;;  %v920_v58 = vsel %vm277_vm2, %v1783_v43, %v862_v51  ;;  %v863_v62 = vrot.slane %v1784_v57, 3  ;;  %v991_v51 = vsel %vm273_vm1, %v1792_v39, %v871_v46 }
  0x91   : > { %v922_v63 = vrot.slane %v920_v58, 1  ;;  %v935_v2 = vsel %vm277_vm2, %v1785_v56, %v864_v59  ;;  %v938_v4 = vsel %vm281_vm3, %v1785_v56, %v864_v59  ;;  %v934_v7 = vsel %vm273_vm1, %v1785_v56, %v864_v59 }
  0x92   : > { %v931_v5 = vsel %vm273_vm1, %v1784_v57, %v863_v62  ;;  %v940_v9 = vrot.slane %v938_v4, 2 }
  0x97   : > { %v758_v8 = vld [vmem:[#allocation1] sm:$0xff] }
  0x98   : > { %760 = vst [vmem:[#allocation1] ss:$9 sm:$0xff] %v375_v1  ;;  %v928_v1 = vrot.slane %v926_v61, 3 }
  0x99   : > { %762 = vst [vmem:[#allocation1 + $0x1] ss:$9 sm:$0xff] %v378_v3 }
  0x9a   : > { %763 = vst [vmem:[#allocation1 + $0x2] ss:$9 sm:$0xff] %v381_v6  ;;  %1773 = vmatmul.msk.bf16.gmra.mxu1 %vm648_vm5, %v758_v8  ;;  %v941_v6 = vsel %vm285_vm4, %v1785_v56, %v864_v59  ;;  %v937_v8 = vrot.slane %v935_v2, 1 }
  0x9b   : > { %764 = vst [vmem:[#allocation1 + $0x3] ss:$9 sm:$0xff] %v384_v10  ;;  %v943_v10 = vrot.slane %v941_v6, 3 }
  0x9c   : > { %766 = vst [vmem:[#allocation1 + $0x4] ss:$9 sm:$0xff] %v387_v11  ;;  %v1787_v11 = vld [vmem:[%s1905_s21 + $0x38] sm:$0xf] }
  0x9d   : > { %768 = vst [vmem:[#allocation1 + $0x5] ss:$9 sm:$0xff] %v390_v12  ;;  %v1786_v12 = vld [vmem:[%s1905_s21 + $0x34] sm:$0x1] }
  0x9e   : > { %770 = vst [vmem:[#allocation1 + $0x6] ss:$9 sm:$0xff] %v393_v13  ;;  %v866_v13 = vrot.slane %v1787_v11, 3 }
  0x9f   : > { %771 = vst [vmem:[#allocation1 + $0x7] ss:$9 sm:$0xff] %v396_v15  ;;  %v865_v15 = vrot.slane %v1786_v12, 3 }
  0xa0   : > { %v950_v17 = vsel %vm277_vm2, %v1787_v11, %v866_v13  ;;  %v953_v19 = vsel %vm281_vm3, %v1787_v11, %v866_v13  ;;  %v956_v21 = vsel %vm285_vm4, %v1787_v11, %v866_v13  ;;  %v949_v23 = vsel %vm273_vm1, %v1787_v11, %v866_v13 }
  0xa1   : > { %v946_v20 = vsel %vm273_vm1, %v1786_v12, %v865_v15 }
  0xa6   : > { %v772_v27 = vld [vmem:[#allocation1] sm:$0xff] }
  0xa7   : > { %994 = vst [vmem:[#allocation1] ss:$9 sm:$0xff] %v874_v24  ;;  %v952_v24 = vrot.slane %v950_v17, 1 }
  0xa8   : > { %997 = vst [vmem:[#allocation1 + $0x1] ss:$9 sm:$0xff] %v877_v25 }
  0xa9   : > { %1000 = vst [vmem:[#allocation1 + $0x2] ss:$9 sm:$0xff] %v880_v26  ;;  %v955_v26 = vrot.slane %v953_v19, 2 }
  0xaa   : > { %1003 = vst [vmem:[#allocation1 + $0x3] ss:$9 sm:$0xff] %v883_v28  ;;  %1774 = vmatmul.msk.bf16.gmra.mxu1 %vm648_vm5, %v772_v27  ;;  %v958_v27 = vrot.slane %v956_v21, 3  ;;  %v965_v28 = vsel %vm277_vm2, %v1789_v14, %v868_v18 }
  0xab   : > { %1005 = vst [vmem:[#allocation1 + $0x4] ss:$9 sm:$0xff] %v886_v31  ;;  %v967_v31 = vrot.slane %v965_v28, 1 }
  0xac   : > { %1007 = vst [vmem:[#allocation1 + $0x5] ss:$9 sm:$0xff] %v889_v32  ;;  %v1791_v32 = vld [vmem:[%s1905_s21 + $0x48] sm:$0xf] }
  0xad   : > { %1010 = vst [vmem:[#allocation1 + $0x6] ss:$9 sm:$0xff] %v892_v33  ;;  %v1790_v33 = vld [vmem:[%s1905_s21 + $0x44] sm:$0x1] }
  0xae   : > { %1013 = vst [vmem:[#allocation1 + $0x7] ss:$9 sm:$0xff] %v895_v34  ;;  %v870_v34 = vrot.slane %v1791_v32, 3  ;;  %v869_v37 = vrot.slane %v1790_v33, 3 }
  0xb0   : > { %v983_v42 = vsel %vm281_vm3, %v1791_v32, %v870_v34  ;;  %v976_v44 = vsel %vm273_vm1, %v1790_v33, %v869_v37 }
  0xb2   : > { %v677_v4 = vpop.f32.mrf.mxu3 }
  0xb5   : > { %v1014_v47 = vld [vmem:[#allocation1] sm:$0xff] }
  0xb6   : > { %1794 = vmatmul.msk.bf16.vlgmr.msra.gmra.mxu0 %vm648_vm5, %v1014_v47  ;;  %1016 = vst [vmem:[#allocation1] ss:$9 sm:$0xff] %v898_v41  ;;  %v980_v41 = vsel %vm277_vm2, %v1791_v32, %v870_v34  ;;  %v979_v47 = vsel %vm273_vm1, %v1791_v32, %v870_v34 }
  0xb7   : > { %1017 = vst [vmem:[#allocation1 + $0x1] ss:$9 sm:$0xff] %v901_v45  ;;  %v986_v45 = vsel %vm285_vm4, %v1791_v32, %v870_v34  ;;  %v982_v48 = vrot.slane %v980_v41, 1 }
  0xb8   : > { %1018 = vst [vmem:[#allocation1 + $0x2] ss:$9 sm:$0xff] %v904_v49  ;;  %v985_v49 = vrot.slane %v983_v42, 2 }
  0xb9   : > { %1020 = vst [vmem:[#allocation1 + $0x3] ss:$9 sm:$0xff] %v907_v50  ;;  %v988_v50 = vrot.slane %v986_v45, 3 }
  0xba   : > { %1022 = vst [vmem:[#allocation1 + $0x4] ss:$9 sm:$0xff] %v910_v52  ;;  %v679_v12 = vpop.f32.mrf.mxu3 }
  0xbb   : > { %1024 = vst [vmem:[#allocation1 + $0x5] ss:$9 sm:$0xff] %v913_v53  ;;  %v672_v53 = vpop.f32.mrf.mxu0 }
  0xbc   : > { %1025 = vst [vmem:[#allocation1 + $0x6] ss:$9 sm:$0xff] %v916_v54 }
  0xbd   : > { %1026 = vst [vmem:[#allocation1 + $0x7] ss:$9 sm:$0xff] %v919_v55 }
  0xc2   : > { %v682_v22 = vpop.f32.mrf.mxu3 }
  0xc3   : > { %v674_v54 = vpop.f32.mrf.mxu0 }
  0xc4   : > { %v1027_v3 = vld [vmem:[#allocation1] sm:$0xff] }
  0xc5   : > { %1795 = vmatmul.msk.bf16.vlgmr.msra.gmra.mxu2 %vm648_vm5, %v1027_v3  ;;  %1029 = vst [vmem:[#allocation1] ss:$9 sm:$0xff] %v922_v63 }
  0xc6   : > { %1031 = vst [vmem:[#allocation1 + $0x1] ss:$9 sm:$0xff] %v925_v0 }
  0xc7   : > { %1033 = vst [vmem:[#allocation1 + $0x2] ss:$9 sm:$0xff] %v928_v1 }
  0xc8   : > { %1034 = vst [vmem:[#allocation1 + $0x3] ss:$9 sm:$0xff] %v931_v5 }
  0xc9   : > { %1035 = vst [vmem:[#allocation1 + $0x4] ss:$9 sm:$0xff] %v934_v7 }
  0xca   : > { %1037 = vst [vmem:[#allocation1 + $0x5] ss:$9 sm:$0xff] %v937_v8 }
  0xcb   : > { %1039 = vst [vmem:[#allocation1 + $0x6] ss:$9 sm:$0xff] %v940_v9 }
  0xcc   : > { %1041 = vst [vmem:[#allocation1 + $0x7] ss:$9 sm:$0xff] %v943_v10 }
  0xd3   : > { %v1042_v25 = vld [vmem:[#allocation1] sm:$0xff] }
  0xd4   : > { %1043 = vst [vmem:[#allocation1] ss:$9 sm:$0xff] %v946_v20 }
  0xd5   : > { %1796 = vmatmul.msk.bf16.gmra.mxu2 %vm648_vm5, %v1042_v25  ;;  %1044 = vst [vmem:[#allocation1 + $0x1] ss:$9 sm:$0xff] %v949_v23 }
  0xd6   : > { %1046 = vst [vmem:[#allocation1 + $0x2] ss:$9 sm:$0xff] %v952_v24 }
  0xd7   : > { %1048 = vst [vmem:[#allocation1 + $0x3] ss:$9 sm:$0xff] %v955_v26 }
  0xd8   : > { %1050 = vst [vmem:[#allocation1 + $0x4] ss:$9 sm:$0xff] %v958_v27 }
  0xd9   : > { %1051 = vst [vmem:[#allocation1 + $0x5] ss:$9 sm:$0xff] %v961_v29 }
  0xda   : > { %1052 = vst [vmem:[#allocation1 + $0x6] ss:$9 sm:$0xff] %v964_v30  ;;  %v684_v30 = vpop.f32.mrf.mxu3 }
  0xdb   : > { %1054 = vst [vmem:[#allocation1 + $0x7] ss:$9 sm:$0xff] %v967_v31 }
  0xe2   : > { %v1055_v43 = vld [vmem:[#allocation1] sm:$0xff] }
  0xe3   : > { %1057 = vst [vmem:[#allocation1] ss:$9 sm:$0xff] %v970_v38 }
  0xe4   : > { %1059 = vst [vmem:[#allocation1 + $0x1] ss:$9 sm:$0xff] %v973_v40  ;;  %v687_v40 = vpop.f32.mrf.mxu3 }
  0xe5   : > { %1797 = vmatmul.msk.bf16.gmra.mxu2 %vm648_vm5, %v1055_v43  ;;  %1060 = vst [vmem:[#allocation1 + $0x2] ss:$9 sm:$0xff] %v976_v44 }
  0xe6   : > { %1061 = vst [vmem:[#allocation1 + $0x3] ss:$9 sm:$0xff] %v979_v47 }
  0xe7   : > { %1063 = vst [vmem:[#allocation1 + $0x4] ss:$9 sm:$0xff] %v982_v48 }
  0xe8   : > { %1065 = vst [vmem:[#allocation1 + $0x5] ss:$9 sm:$0xff] %v985_v49  ;;  %v795_v55 = vpop.f32.mrf.mxu0 }
  0xe9   : > { %1067 = vst [vmem:[#allocation1 + $0x6] ss:$9 sm:$0xff] %v988_v50  ;;  %v796_v57 = vadd.f32 %v795_v55, %v672_v53 }
  0xea   : > { %1068 = vst [vmem:[#allocation1 + $0x7] ss:$9 sm:$0xff] %v991_v51 }
  0xec   : > { %v689_v50 = vpop.f32.mrf.mxu3 }
  0xf0   : > { %v797_v56 = vpop.f32.mrf.mxu0 }
  0xf1   : > { %v1069_v52 = vld [vmem:[#allocation1] sm:$0xff]  ;;  %v798_v63 = vadd.f32 %v797_v56, %v674_v54 }
  0xf5   : > { %1798 = vmatmul.msk.bf16.gmra.mxu2 %vm648_vm5, %v1069_v52 }
  0xf7   : > { %v800_v5 = vpop.f32.mrf.mxu1 }
  0xf8   : > { %v801_v8 = vadd.f32 %v800_v5, %v677_v4  ;;  %v692_v4 = vpop.f32.mrf.mxu3 }
  0xff   : > { %v802_v13 = vpop.f32.mrf.mxu1 }
 0x100   : > { %v803_v15 = vadd.f32 %v802_v13, %v679_v12 }
 0x107   : > { %v805_v23 = vpop.f32.mrf.mxu1 }
 0x108   : > { %v806_v26 = vadd.f32 %v805_v23, %v682_v22 }
 0x10f   : > { %v807_v31 = vpop.f32.mrf.mxu1 }
 0x110   : > { %v808_v38 = vadd.f32 %v807_v31, %v684_v30 }
 0x117   : > { %v810_v41 = vpop.f32.mrf.mxu1 }
 0x118   : > { %v811_v42 = vadd.f32 %v810_v41, %v687_v40 }
 0x11f   : > { %v812_v51 = vpop.f32.mrf.mxu1 }
 0x120   : > { %v813_v53 = vadd.f32 %v812_v51, %v689_v50 }
 0x127   : > { %v815_v5 = vpop.f32.mrf.mxu1 }
 0x12f   : > { %v817_v22 = vpop.f32.mrf.mxu1 }
 0x133   : > { %v1092_v58 = vpop.f32.mrf.mxu0 }
 0x134   : > { %v2098_v59 = vadd.f32 %v1092_v58, %v796_v57 }
 0x136   : > { %v2102_v60 = vrot.slane %v2098_v59, 2  ;;  %v2105_v61 = vrot.slane %v2098_v59, 4  ;;  %v2108_v62 = vrot.slane %v2098_v59, 6  ;;  %1197 = vst [vmem:[#allocation1] ss:$4 sm:$0xff] %v2098_v59 }
 0x138   : > { %1203 = vst [vmem:[#allocation1 + $0x3] ss:$4 sm:$0xff] %v2108_v62 }
 0x139   : > { %1199 = vst [vmem:[#allocation1 + $0x1] ss:$4 sm:$0xff] %v2102_v60 }
 0x13a   : > { %1201 = vst [vmem:[#allocation1 + $0x2] ss:$4 sm:$0xff] %v2105_v61 }
 0x13b   : > { %v1094_v0 = vpop.f32.mrf.mxu0 }
 0x13c   : > { %v2114_v1 = vadd.f32 %v1094_v0, %v798_v63 }
 0x13e   : > { %v2117_v2 = vrot.slane %v2114_v1, 2  ;;  %1205 = vst [vmem:[#allocation1 + $0x20] ss:$4 sm:$0xff] %v2114_v1  ;;  %v2121_v3 = vrot.slane %v2114_v1, 4  ;;  %v2124_v6 = vrot.slane %v2114_v1, 6 }
 0x141   : > { %v1206_v7 = vld.sshfl [vmem:[#allocation1] sm:$0xff pattern:$0x73625140] }
 0x142   : > { %1208 = vst [vmem:[#allocation1] ss:$4 sm:$0xff] %v2117_v2 }
 0x143   : > { %1209 = vst [vmem:[#allocation1 + $0x1] ss:$4 sm:$0xff] %v2121_v3 }
 0x144   : > { %1210 = vst [vmem:[#allocation1 + $0x2] ss:$4 sm:$0xff] %v2124_v6 }
 0x145   : > { %v1207_v9 = vld.sshfl [vmem:[#allocation1 + $0x20] sm:$0xff pattern:$0x73625140]  ;;  %1274 = vst.msk [vmem:[%s2130_s30] sm:$0xff] %vm1273_vm6, %v1206_v7  ;;  %v816_v7 = vadd.f32 %v815_v5, %v692_v4 }
 0x146   : > { %1276 = vst.msk [vmem:[%s2130_s30 + $0x8] sm:$0x3] %vm1275_vm7, %v1207_v9 }
 0x148   : > { %v1097_v10 = vpop.f32.mrf.mxu2 }
 0x149   : > { %v2138_v11 = vadd.f32 %v1097_v10, %v801_v8 }
 0x14b   : > { %v2141_v14 = vrot.slane %v2138_v11, 2  ;;  %1211 = vst [vmem:[#allocation1 + $0x3] ss:$4 sm:$0xff] %v2138_v11  ;;  %v2146_v17 = vrot.slane %v2138_v11, 4  ;;  %v2151_v19 = vrot.slane %v2138_v11, 6 }
 0x14d   : > { %1212 = vst [vmem:[#allocation1 + $0x20] ss:$4 sm:$0xff] %v2141_v14 }
 0x150   : > { %v1099_v16 = vpop.f32.mrf.mxu2 }
 0x151   : > { %v2148_v18 = vadd.f32 %v1099_v16, %v803_v15 }
 0x152   : > { %v1213_v20 = vld.sshfl [vmem:[#allocation1] sm:$0xff pattern:$0x73625140] }
 0x153   : > { %1215 = vst [vmem:[#allocation1] ss:$4 sm:$0xff] %v2146_v17  ;;  %v2156_v24 = vrot.slane %v2148_v18, 2  ;;  %v2161_v25 = vrot.slane %v2148_v18, 4  ;;  %v2171_v29 = vrot.slane %v2148_v18, 6 }
 0x154   : > { %v1214_v21 = vld.sshfl [vmem:[#allocation1 + $0x20] sm:$0xff pattern:$0x73625140]  ;;  %1216 = vst [vmem:[#allocation1 + $0x1] ss:$4 sm:$0xff] %v2151_v19 }
 0x155   : > { %1277 = vst.msk [vmem:[%s2130_s30 + $0x10] sm:$0xff] %vm1273_vm6, %v1213_v20 }
 0x156   : > { %1278 = vst.msk [vmem:[%s2130_s30 + $0x18] sm:$0x3] %vm1275_vm7, %v1214_v21  ;;  %v694_v21 = vpop.f32.mrf.mxu3 }
 0x157   : > { %1217 = vst [vmem:[#allocation1 + $0x2] ss:$4 sm:$0xff] %v2148_v18 }
 0x158   : > { %1218 = vst [vmem:[#allocation1 + $0x3] ss:$4 sm:$0xff] %v2156_v24  ;;  %v1102_v27 = vpop.f32.mrf.mxu2 }
 0x159   : > { %1219 = vst [vmem:[#allocation1 + $0x20] ss:$4 sm:$0xff] %v2161_v25  ;;  %v2168_v28 = vadd.f32 %v1102_v27, %v806_v26  ;;  %v818_v26 = vadd.f32 %v817_v22, %v694_v21 }
 0x15b   : > { %v2175_v34 = vrot.slane %v2168_v28, 2  ;;  %v2180_v36 = vrot.slane %v2168_v28, 4  ;;  %v2185_v37 = vrot.slane %v2168_v28, 6 }
 0x15f   : > { %v1220_v32 = vld.sshfl [vmem:[#allocation1] sm:$0xff pattern:$0x73625140] }
 0x160   : > { %v1221_v33 = vld.sshfl [vmem:[#allocation1 + $0x20] sm:$0xff pattern:$0x73625140]  ;;  %1222 = vst [vmem:[#allocation1] ss:$4 sm:$0xff] %v2171_v29  ;;  %v1104_v35 = vpop.f32.mrf.mxu2 }
 0x161   : > { %1279 = vst.msk [vmem:[%s2130_s30 + $0x20] sm:$0xff] %vm1273_vm6, %v1220_v32  ;;  %v2191_v39 = vadd.f32 %v1104_v35, %v808_v38 }
 0x162   : > { %1280 = vst.msk [vmem:[%s2130_s30 + $0x28] sm:$0x3] %vm1275_vm7, %v1221_v33 }
 0x163   : > { %1223 = vst [vmem:[#allocation1 + $0x1] ss:$4 sm:$0xff] %v2168_v28  ;;  %v2194_v44 = vrot.slane %v2191_v39, 2  ;;  %v2197_v46 = vrot.slane %v2191_v39, 4  ;;  %v2202_v47 = vrot.slane %v2191_v39, 6 }
 0x164   : > { %1224 = vst [vmem:[#allocation1 + $0x2] ss:$4 sm:$0xff] %v2175_v34 }
 0x165   : > { %1225 = vst [vmem:[#allocation1 + $0x3] ss:$4 sm:$0xff] %v2180_v36 }
 0x166   : > { %1226 = vst [vmem:[#allocation1 + $0x20] ss:$4 sm:$0xff] %v2185_v37 }
 0x168   : > { %v1107_v43 = vpop.f32.mrf.mxu2 }
 0x169   : > { %v2205_v48 = vadd.f32 %v1107_v43, %v811_v42 }
 0x16b   : > { %v2214_v54 = vrot.slane %v2205_v48, 2  ;;  %v2217_v55 = vrot.slane %v2205_v48, 4  ;;  %v2222_v58 = vrot.slane %v2205_v48, 6 }
 0x16c   : > { %v1227_v45 = vld.sshfl [vmem:[#allocation1] sm:$0xff pattern:$0x73625140] }
 0x16d   : > { %1281 = vst.msk [vmem:[%s2130_s30 + $0x30] sm:$0xff] %vm1273_vm6, %v1227_v45  ;;  %v1228_v49 = vld.sshfl [vmem:[#allocation1 + $0x20] sm:$0xff pattern:$0x73625140] }
 0x16e   : > { %1229 = vst [vmem:[#allocation1] ss:$4 sm:$0xff] %v2191_v39 }
 0x16f   : > { %1230 = vst [vmem:[#allocation1 + $0x1] ss:$4 sm:$0xff] %v2194_v44 }
 0x170   : > { %1231 = vst [vmem:[#allocation1 + $0x2] ss:$4 sm:$0xff] %v2197_v46  ;;  %v1109_v52 = vpop.f32.mrf.mxu2 }
 0x171   : > { %1232 = vst [vmem:[#allocation1 + $0x3] ss:$4 sm:$0xff] %v2202_v47  ;;  %v2219_v56 = vadd.f32 %v1109_v52, %v813_v53 }
 0x172   : > { %1233 = vst [vmem:[#allocation1 + $0x20] ss:$4 sm:$0xff] %v2205_v48 }
 0x173   : > { %1282 = vst.msk [vmem:[%s2130_s30 + $0x38] sm:$0x3] %vm1275_vm7, %v1228_v49  ;;  %v2229_v0 = vrot.slane %v2219_v56, 2  ;;  %v2239_v10 = vrot.slane %v2219_v56, 4  ;;  %v2242_v12 = vrot.slane %v2219_v56, 6 }
 0x178   : > { %v1234_v57 = vld.sshfl [vmem:[#allocation1] sm:$0xff pattern:$0x73625140]  ;;  %v1112_v8 = vpop.f32.mrf.mxu2 }
 0x179   : > { %1283 = vst.msk [vmem:[%s2130_s30 + $0x40] sm:$0xff] %vm1273_vm6, %v1234_v57  ;;  %v1235_v63 = vld.sshfl [vmem:[#allocation1 + $0x20] sm:$0xff pattern:$0x73625140]  ;;  %v2236_v9 = vadd.f32 %v1112_v8, %v816_v7 }
 0x17a   : > { %1236 = vst [vmem:[#allocation1] ss:$4 sm:$0xff] %v2214_v54 }
 0x17b   : > { %1237 = vst [vmem:[#allocation1 + $0x1] ss:$4 sm:$0xff] %v2217_v55  ;;  %v2247_v16 = vrot.slane %v2236_v9, 2  ;;  %v2252_v20 = vrot.slane %v2236_v9, 4  ;;  %v2262_v30 = vrot.slane %v2236_v9, 6 }
 0x17c   : > { %1238 = vst [vmem:[#allocation1 + $0x2] ss:$4 sm:$0xff] %v2222_v58 }
 0x17d   : > { %1284 = vst.msk [vmem:[%s2130_s30 + $0x48] sm:$0x3] %vm1275_vm7, %v1235_v63 }
 0x17e   : > { %1239 = vst [vmem:[#allocation1 + $0x3] ss:$4 sm:$0xff] %v2219_v56 }
 0x17f   : > { %1240 = vst [vmem:[#allocation1 + $0x20] ss:$4 sm:$0xff] %v2229_v0 }
 0x180   : > { %v1114_v23 = vpop.f32.mrf.mxu2 }
 0x181   : > { %v2259_v27 = vadd.f32 %v1114_v23, %v818_v26 }
 0x183   : > { %v2266_v33 = vrot.slane %v2259_v27, 2  ;;  %v2271_v35 = vrot.slane %v2259_v27, 4  ;;  %v2276_v38 = vrot.slane %v2259_v27, 6 }
 0x185   : > { %v1241_v13 = vld.sshfl [vmem:[#allocation1] sm:$0xff pattern:$0x73625140] }
 0x186   : > { %v1242_v15 = vld.sshfl [vmem:[#allocation1 + $0x20] sm:$0xff pattern:$0x73625140]  ;;  %1243 = vst [vmem:[#allocation1] ss:$4 sm:$0xff] %v2239_v10 }
 0x187   : > { %1244 = vst [vmem:[#allocation1 + $0x1] ss:$4 sm:$0xff] %v2242_v12 }
 0x188   : > { %1285 = vst.msk [vmem:[%s2130_s30 + $0x50] sm:$0xff] %vm1273_vm6, %v1241_v13 }
 0x189   : > { %1286 = vst.msk [vmem:[%s2130_s30 + $0x58] sm:$0x3] %vm1275_vm7, %v1242_v15 }
 0x18a   : > { %1245 = vst [vmem:[#allocation1 + $0x2] ss:$4 sm:$0xff] %v2236_v9 }
 0x18b   : > { %1246 = vst [vmem:[#allocation1 + $0x3] ss:$4 sm:$0xff] %v2247_v16 }
 0x18c   : > { %1247 = vst [vmem:[#allocation1 + $0x20] ss:$4 sm:$0xff] %v2252_v20 }
 0x192   : > { %v1248_v31 = vld.sshfl [vmem:[#allocation1] sm:$0xff pattern:$0x73625140] }
 0x193   : > { %v1249_v32 = vld.sshfl [vmem:[#allocation1 + $0x20] sm:$0xff pattern:$0x73625140]  ;;  %1250 = vst [vmem:[#allocation1] ss:$4 sm:$0xff] %v2262_v30 }
 0x194   : > { %1287 = vst.msk [vmem:[%s2130_s30 + $0x60] sm:$0xff] %vm1273_vm6, %v1248_v31 }
 0x195   : > { %1288 = vst.msk [vmem:[%s2130_s30 + $0x68] sm:$0x3] %vm1275_vm7, %v1249_v32 }
 0x196   : > { %1251 = vst [vmem:[#allocation1 + $0x1] ss:$4 sm:$0xff] %v2259_v27 }
 0x197   : > { %1252 = vst [vmem:[#allocation1 + $0x2] ss:$4 sm:$0xff] %v2266_v33 }
 0x198   : > { %1253 = vst [vmem:[#allocation1 + $0x3] ss:$4 sm:$0xff] %v2271_v35 }
 0x199   : > { %1254 = vst [vmem:[#allocation1 + $0x20] ss:$4 sm:$0xff] %v2276_v38 }
 0x19f   : > { %v1255_v40 = vld.sshfl [vmem:[#allocation1] sm:$0xff pattern:$0x73625140] }
 0x1a0   : > { %v1256_v41 = vld.sshfl [vmem:[#allocation1 + $0x20] sm:$0xff pattern:$0x73625140]  ;;  %1289 = vst.msk [vmem:[%s2130_s30 + $0x70] sm:$0xff] %vm1273_vm6, %v1255_v40 }
 0x1a1   : > { %1290 = vst.msk [vmem:[%s2130_s30 + $0x78] sm:$0x3] %vm1275_vm7, %v1256_v41 }
 0x1a2   : > { %1291 = vst [vmem:[#allocation1] ss:$4 sm:$0xff] %v2098_v59 }
 0x1a3   : > { %1293 = vst [vmem:[#allocation1 + $0x1] ss:$4 sm:$0xff] %v2102_v60 }
 0x1a4   : > { %1295 = vst [vmem:[#allocation1 + $0x2] ss:$4 sm:$0xff] %v2105_v61 }
 0x1a5   : > { %1297 = vst [vmem:[#allocation1 + $0x3] ss:$4 sm:$0xff] %v2108_v62 }
 0x1a6   : > { %1299 = vst [vmem:[#allocation1 + $0x20] ss:$4 sm:$0xff] %v2114_v1 }
 0x1ac   : > { %v1300_v42 = vld.sshfl [vmem:[#allocation1] sm:$0xff pattern:$0x73625140] }
 0x1ad   : > { %1302 = vst [vmem:[#allocation1] ss:$4 sm:$0xff] %v2117_v2  ;;  %v1301_v43 = vld.sshfl [vmem:[#allocation1 + $0x20] sm:$0xff pattern:$0x73625140]  ;;  %v1367_v57 = vsel %vm1273_vm6, %v1300_v42, 0.0 }
 0x1ae   : > { %1303 = vst [vmem:[#allocation1 + $0x1] ss:$4 sm:$0xff] %v2121_v3  ;;  %v1368_v63 = vsel %vm1275_vm7, %v1301_v43, 0.0 }
 0x1af   : > { %1304 = vst [vmem:[#allocation1 + $0x2] ss:$4 sm:$0xff] %v2124_v6  ;;  %v1369_v5 = vadd.f32 %v1368_v63, %v1367_v57 }
 0x1b0   : > { %1305 = vst [vmem:[#allocation1 + $0x3] ss:$4 sm:$0xff] %v2138_v11 }
 0x1b1   : > { %1306 = vst [vmem:[#allocation1 + $0x20] ss:$4 sm:$0xff] %v2141_v14 }
 0x1b7   : > { %v1307_v45 = vld.sshfl [vmem:[#allocation1] sm:$0xff pattern:$0x73625140] }
 0x1b8   : > { %1309 = vst [vmem:[#allocation1] ss:$4 sm:$0xff] %v2146_v17  ;;  %v1308_v49 = vld.sshfl [vmem:[#allocation1 + $0x20] sm:$0xff pattern:$0x73625140]  ;;  %v1370_v4 = vsel %vm1273_vm6, %v1307_v45, 0.0 }
 0x1b9   : > { %1310 = vst [vmem:[#allocation1 + $0x1] ss:$4 sm:$0xff] %v2151_v19  ;;  %v1371_v7 = vadd.f32 %v1370_v4, %v1369_v5  ;;  %v1372_v13 = vsel %vm1275_vm7, %v1308_v49, 0.0 }
 0x1ba   : > { %1311 = vst [vmem:[#allocation1 + $0x2] ss:$4 sm:$0xff] %v2148_v18 }
 0x1bb   : > { %1312 = vst [vmem:[#allocation1 + $0x3] ss:$4 sm:$0xff] %v2156_v24  ;;  %v1373_v22 = vadd.f32 %v1372_v13, %v1371_v7 }
 0x1bc   : > { %1313 = vst [vmem:[#allocation1 + $0x20] ss:$4 sm:$0xff] %v2161_v25 }
 0x1c2   : > { %v1314_v50 = vld.sshfl [vmem:[#allocation1] sm:$0xff pattern:$0x73625140] }
 0x1c3   : > { %1316 = vst [vmem:[#allocation1] ss:$4 sm:$0xff] %v2171_v29  ;;  %v1315_v51 = vld.sshfl [vmem:[#allocation1 + $0x20] sm:$0xff pattern:$0x73625140]  ;;  %v1374_v21 = vsel %vm1273_vm6, %v1314_v50, 0.0 }
 0x1c4   : > { %1317 = vst [vmem:[#allocation1 + $0x1] ss:$4 sm:$0xff] %v2168_v28  ;;  %v1375_v23 = vadd.f32 %v1374_v21, %v1373_v22  ;;  %v1376_v26 = vsel %vm1275_vm7, %v1315_v51, 0.0  ;;  %v1407_v22 = vmul.f32 %v2102_v60, %v2102_v60 }
 0x1c5   : > { %1318 = vst [vmem:[#allocation1 + $0x2] ss:$4 sm:$0xff] %v2175_v34 }
 0x1c6   : > { %1319 = vst [vmem:[#allocation1 + $0x3] ss:$4 sm:$0xff] %v2180_v36  ;;  %v1377_v32 = vadd.f32 %v1376_v26, %v1375_v23 }
 0x1c7   : > { %1320 = vst [vmem:[#allocation1 + $0x20] ss:$4 sm:$0xff] %v2185_v37 }
 0x1cd   : > { %v1321_v52 = vld.sshfl [vmem:[#allocation1] sm:$0xff pattern:$0x73625140] }
 0x1ce   : > { %1323 = vst [vmem:[#allocation1] ss:$4 sm:$0xff] %v2191_v39  ;;  %v1322_v53 = vld.sshfl [vmem:[#allocation1 + $0x20] sm:$0xff pattern:$0x73625140]  ;;  %v1378_v31 = vsel %vm1273_vm6, %v1321_v52, 0.0 }
 0x1cf   : > { %1324 = vst [vmem:[#allocation1 + $0x1] ss:$4 sm:$0xff] %v2194_v44  ;;  %v1379_v41 = vadd.f32 %v1378_v31, %v1377_v32  ;;  %v1380_v43 = vsel %vm1275_vm7, %v1322_v53, 0.0  ;;  %v1408_v31 = vmul.f32 %v2105_v61, %v2105_v61 }
 0x1d0   : > { %1325 = vst [vmem:[#allocation1 + $0x2] ss:$4 sm:$0xff] %v2197_v46 }
 0x1d1   : > { %1326 = vst [vmem:[#allocation1 + $0x3] ss:$4 sm:$0xff] %v2202_v47  ;;  %v1381_v49 = vadd.f32 %v1380_v43, %v1379_v41  ;;  %v1409_v41 = vmul.f32 %v2108_v62, %v2108_v62  ;;  %v1412_v62 = vmul.f32 %v2121_v3, %v2121_v3 }
 0x1d2   : > { %1327 = vst [vmem:[#allocation1 + $0x20] ss:$4 sm:$0xff] %v2205_v48 }
 0x1d8   : > { %v1328_v8 = vld.sshfl [vmem:[#allocation1] sm:$0xff pattern:$0x73625140] }
 0x1d9   : > { %1330 = vst [vmem:[#allocation1] ss:$4 sm:$0xff] %v2214_v54  ;;  %v1329_v15 = vld.sshfl [vmem:[#allocation1 + $0x20] sm:$0xff pattern:$0x73625140]  ;;  %v1382_v45 = vsel %vm1273_vm6, %v1328_v8, 0.0 }
 0x1da   : > { %1331 = vst [vmem:[#allocation1 + $0x1] ss:$4 sm:$0xff] %v2217_v55  ;;  %v1383_v50 = vadd.f32 %v1382_v45, %v1381_v49  ;;  %v1384_v51 = vsel %vm1275_vm7, %v1329_v15, 0.0  ;;  %v1406_v15 = vmul.f32 %v2098_v59, %v2098_v59  ;;  %v1410_v59 = vmul.f32 %v2114_v1, %v2114_v1 }
 0x1db   : > { %1332 = vst [vmem:[#allocation1 + $0x2] ss:$4 sm:$0xff] %v2222_v58  ;;  %v1411_v49 = vmul.f32 %v2117_v2, %v2117_v2  ;;  %v1413_v1 = vmul.f32 %v2124_v6, %v2124_v6  ;;  %v1416_v6 = vmul.f32 %v2146_v17, %v2146_v17  ;;  %v1421_v17 = vmul.f32 %v2171_v29, %v2171_v29 }
 0x1dc   : > { %1333 = vst [vmem:[#allocation1 + $0x3] ss:$4 sm:$0xff] %v2219_v56  ;;  %v1385_v57 = vadd.f32 %v1384_v51, %v1383_v50  ;;  %v1426_v29 = vmul.f32 %v2191_v39, %v2191_v39 }
 0x1dd   : > { %1334 = vst [vmem:[#allocation1 + $0x20] ss:$4 sm:$0xff] %v2229_v0 }
 0x1e3   : > { %v1335_v40 = vld.sshfl [vmem:[#allocation1] sm:$0xff pattern:$0x73625140] }
 0x1e4   : > { %1337 = vst [vmem:[#allocation1] ss:$4 sm:$0xff] %v2239_v10  ;;  %v1336_v42 = vld.sshfl [vmem:[#allocation1 + $0x20] sm:$0xff pattern:$0x73625140]  ;;  %v1386_v52 = vsel %vm1273_vm6, %v1335_v40, 0.0 }
 0x1e5   : > { %1338 = vst [vmem:[#allocation1 + $0x1] ss:$4 sm:$0xff] %v2242_v12  ;;  %v1387_v4 = vadd.f32 %v1386_v52, %v1385_v57  ;;  %v1388_v53 = vsel %vm1275_vm7, %v1336_v42, 0.0  ;;  %v1414_v57 = vmul.f32 %v2138_v11, %v2138_v11  ;;  %v1417_v11 = vmul.f32 %v2151_v19, %v2151_v19 }
 0x1e6   : > { %1339 = vst [vmem:[#allocation1 + $0x2] ss:$4 sm:$0xff] %v2236_v9  ;;  %v1422_v19 = vmul.f32 %v2168_v28, %v2168_v28  ;;  %v1427_v28 = vmul.f32 %v2194_v44, %v2194_v44 }
 0x1e7   : > { %1340 = vst [vmem:[#allocation1 + $0x3] ss:$4 sm:$0xff] %v2247_v16  ;;  %v1389_v8 = vadd.f32 %v1388_v53, %v1387_v4  ;;  %v1415_v4 = vmul.f32 %v2141_v14, %v2141_v14  ;;  %v1419_v53 = vmul.f32 %v2156_v24, %v2156_v24  ;;  %v1424_v24 = vmul.f32 %v2180_v36, %v2180_v36 }
 0x1e8   : > { %1341 = vst [vmem:[#allocation1 + $0x20] ss:$4 sm:$0xff] %v2252_v20  ;;  %v1429_v36 = vmul.f32 %v2202_v47, %v2202_v47  ;;  %v1432_v47 = vmul.f32 %v2217_v55, %v2217_v55 }
 0x1ee   : > { %v1342_v63 = vld.sshfl [vmem:[#allocation1] sm:$0xff pattern:$0x73625140] }
 0x1ef   : > { %1344 = vst [vmem:[#allocation1] ss:$4 sm:$0xff] %v2262_v30  ;;  %v1343_v5 = vld.sshfl [vmem:[#allocation1 + $0x20] sm:$0xff pattern:$0x73625140]  ;;  %v1390_v7 = vsel %vm1273_vm6, %v1342_v63, 0.0 }
 0x1f0   : > { %1345 = vst [vmem:[#allocation1 + $0x1] ss:$4 sm:$0xff] %v2259_v27  ;;  %v1391_v13 = vadd.f32 %v1390_v7, %v1389_v8  ;;  %v1392_v21 = vsel %vm1275_vm7, %v1343_v5, 0.0  ;;  %v1418_v5 = vmul.f32 %v2148_v18, %v2148_v18  ;;  %v1420_v8 = vmul.f32 %v2161_v25, %v2161_v25 }
 0x1f1   : > { %1346 = vst [vmem:[#allocation1 + $0x2] ss:$4 sm:$0xff] %v2266_v33  ;;  %v1423_v18 = vmul.f32 %v2175_v34, %v2175_v34  ;;  %v1425_v25 = vmul.f32 %v2185_v37, %v2185_v37  ;;  %v1428_v34 = vmul.f32 %v2197_v46, %v2197_v46  ;;  %v1430_v37 = vmul.f32 %v2205_v48, %v2205_v48 }
 0x1f2   : > { %1347 = vst [vmem:[#allocation1 + $0x3] ss:$4 sm:$0xff] %v2271_v35  ;;  %v1393_v26 = vadd.f32 %v1392_v21, %v1391_v13  ;;  %v1431_v46 = vmul.f32 %v2214_v54, %v2214_v54  ;;  %v1433_v48 = vmul.f32 %v2222_v58, %v2222_v58  ;;  %v1435_v54 = vmul.f32 %v2229_v0, %v2229_v0 }
 0x1f3   : > { %1348 = vst [vmem:[#allocation1 + $0x20] ss:$4 sm:$0xff] %v2276_v38  ;;  %v1438_v0 = vmul.f32 %v2236_v9, %v2236_v9 }
 0x1f9   : > { %v1349_v23 = vld.sshfl [vmem:[#allocation1] sm:$0xff pattern:$0x73625140] }
 0x1fa   : > { %v1350_v32 = vld.sshfl [vmem:[#allocation1 + $0x20] sm:$0xff pattern:$0x73625140]  ;;  %v1394_v40 = vsel %vm1273_vm6, %v1349_v23, 0.0  ;;  %1486 = vst [vmem:[#allocation1] ss:$4 sm:$0xff] %v1406_v15 }
 0x1fb   : > { %v1395_v42 = vadd.f32 %v1394_v40, %v1393_v26  ;;  %1488 = vst [vmem:[#allocation1 + $0x1] ss:$4 sm:$0xff] %v1407_v22  ;;  %v1396_v60 = vsel %vm1275_vm7, %v1350_v32, 0.0 }
 0x1fc   : > { %1490 = vst [vmem:[#allocation1 + $0x2] ss:$4 sm:$0xff] %v1408_v31 }
 0x1fd   : > { %v1397_v43 = vadd.f32 %v1396_v60, %v1395_v42  ;;  %1492 = vst [vmem:[#allocation1 + $0x3] ss:$4 sm:$0xff] %v1409_v41  ;;  %v1434_v41 = vmul.f32 %v2219_v56, %v2219_v56  ;;  %v1436_v56 = vmul.f32 %v2239_v10, %v2239_v10 }
 0x1fe   : > { %1494 = vst [vmem:[#allocation1 + $0x20] ss:$4 sm:$0xff] %v1410_v59 }
 0x1ff   : > { %v1398_v61 = vrot.slane %v1397_v43, 4 }
 0x201   : > { %v1399_v45 = vadd.f32 %v1398_v61, %v1397_v43 }
 0x203   : > { %v1400_v50 = vrot.slane %v1399_v45, 2 }
 0x204   : > { %v1495_v51 = vld.sshfl [vmem:[#allocation1] sm:$0xff pattern:$0x73625140] }
 0x205   : > { %v1401_v52 = vadd.f32 %v1400_v50, %v1399_v45  ;;  %1497 = vst [vmem:[#allocation1] ss:$4 sm:$0xff] %v1411_v49  ;;  %v1496_v63 = vld.sshfl [vmem:[#allocation1 + $0x20] sm:$0xff pattern:$0x73625140]  ;;  %v1562_v39 = vsel %vm1273_vm6, %v1495_v51, 0.0  ;;  %v1437_v45 = vmul.f32 %v2242_v12, %v2242_v12 }
 0x206   : > { %1498 = vst [vmem:[#allocation1 + $0x1] ss:$4 sm:$0xff] %v1412_v62  ;;  %v1563_v44 = vsel %vm1275_vm7, %v1496_v63, 0.0  ;;  %v1439_v62 = vmul.f32 %v2247_v16, %v2247_v16  ;;  %v1441_v16 = vmul.f32 %v2262_v30, %v2262_v30 }
 0x207   : > { %v1402_v2 = vrot.slane %v1401_v52, 1  ;;  %1499 = vst [vmem:[#allocation1 + $0x2] ss:$4 sm:$0xff] %v1413_v1  ;;  %v1564_v26 = vadd.f32 %v1563_v44, %v1562_v39  ;;  %v1440_v1 = vmul.f32 %v2252_v20, %v2252_v20  ;;  %v1442_v20 = vmul.f32 %v2259_v27, %v2259_v27 }
 0x208   : > { %1500 = vst [vmem:[#allocation1 + $0x3] ss:$4 sm:$0xff] %v1414_v57 }
 0x209   : > { %v1403_v3 = vadd.f32 %v1402_v2, %v1401_v52  ;;  %1501 = vst [vmem:[#allocation1 + $0x20] ss:$4 sm:$0xff] %v1415_v4 }
 0x20b   : > { %1405 = vst.msk [vmem:[%s2367_s7] sm:$0x1] %vm1404_vm8, %v1403_v3  ;;  %v1443_v3 = vmul.f32 %v2266_v33, %v2266_v33 }
 0x20f   : > { %v1502_v14 = vld.sshfl [vmem:[#allocation1] sm:$0xff pattern:$0x73625140] }
 0x210   : > { %1504 = vst [vmem:[#allocation1] ss:$4 sm:$0xff] %v1416_v6  ;;  %v1503_v7 = vld.sshfl [vmem:[#allocation1 + $0x20] sm:$0xff pattern:$0x73625140]  ;;  %v1565_v23 = vsel %vm1273_vm6, %v1502_v14, 0.0 }
 0x211   : > { %1505 = vst [vmem:[#allocation1 + $0x1] ss:$4 sm:$0xff] %v1417_v11  ;;  %v1566_v31 = vadd.f32 %v1565_v23, %v1564_v26  ;;  %v1567_v40 = vsel %vm1275_vm7, %v1503_v7, 0.0  ;;  %v1444_v11 = vmul.f32 %v2271_v35, %v2271_v35 }
 0x212   : > { %1506 = vst [vmem:[#allocation1 + $0x2] ss:$4 sm:$0xff] %v1418_v5  ;;  %v1445_v5 = vmul.f32 %v2276_v38, %v2276_v38 }
 0x213   : > { %1507 = vst [vmem:[#allocation1 + $0x3] ss:$4 sm:$0xff] %v1419_v53  ;;  %v1568_v60 = vadd.f32 %v1567_v40, %v1566_v31 }
 0x214   : > { %1508 = vst [vmem:[#allocation1 + $0x20] ss:$4 sm:$0xff] %v1420_v8 }
 0x21a   : > { %v1509_v13 = vld.sshfl [vmem:[#allocation1] sm:$0xff pattern:$0x73625140] }
 0x21b   : > { %1511 = vst [vmem:[#allocation1] ss:$4 sm:$0xff] %v1421_v17  ;;  %v1510_v15 = vld.sshfl [vmem:[#allocation1 + $0x20] sm:$0xff pattern:$0x73625140]  ;;  %v1569_v59 = vsel %vm1273_vm6, %v1509_v13, 0.0 }
 0x21c   : > { %1512 = vst [vmem:[#allocation1 + $0x1] ss:$4 sm:$0xff] %v1422_v19  ;;  %v1570_v55 = vadd.f32 %v1569_v59, %v1568_v60  ;;  %v1571_v58 = vsel %vm1275_vm7, %v1510_v15, 0.0 }
 0x21d   : > { %1513 = vst [vmem:[#allocation1 + $0x2] ss:$4 sm:$0xff] %v1423_v18 }
 0x21e   : > { %1514 = vst [vmem:[#allocation1 + $0x3] ss:$4 sm:$0xff] %v1424_v24  ;;  %v1572_v61 = vadd.f32 %v1571_v58, %v1570_v55 }
 0x21f   : > { %1515 = vst [vmem:[#allocation1 + $0x20] ss:$4 sm:$0xff] %v1425_v25 }
 0x225   : > { %v1516_v21 = vld.sshfl [vmem:[#allocation1] sm:$0xff pattern:$0x73625140] }
 0x226   : > { %1518 = vst [vmem:[#allocation1] ss:$4 sm:$0xff] %v1426_v29  ;;  %v1517_v22 = vld.sshfl [vmem:[#allocation1 + $0x20] sm:$0xff pattern:$0x73625140]  ;;  %v1573_v43 = vsel %vm1273_vm6, %v1516_v21, 0.0 }
 0x227   : > { %1519 = vst [vmem:[#allocation1 + $0x1] ss:$4 sm:$0xff] %v1427_v28  ;;  %v1574_v50 = vadd.f32 %v1573_v43, %v1572_v61  ;;  %v1575_v10 = vsel %vm1275_vm7, %v1517_v22, 0.0 }
 0x228   : > { %1520 = vst [vmem:[#allocation1 + $0x2] ss:$4 sm:$0xff] %v1428_v34 }
 0x229   : > { %1521 = vst [vmem:[#allocation1 + $0x3] ss:$4 sm:$0xff] %v1429_v36  ;;  %v1576_v12 = vadd.f32 %v1575_v10, %v1574_v50 }
 0x22a   : > { %1522 = vst [vmem:[#allocation1 + $0x20] ss:$4 sm:$0xff] %v1430_v37 }
 0x230   : > { %v1523_v32 = vld.sshfl [vmem:[#allocation1] sm:$0xff pattern:$0x73625140] }
 0x231   : > { %1525 = vst [vmem:[#allocation1] ss:$4 sm:$0xff] %v1431_v46  ;;  %v1524_v42 = vld.sshfl [vmem:[#allocation1 + $0x20] sm:$0xff pattern:$0x73625140]  ;;  %v1577_v52 = vsel %vm1273_vm6, %v1523_v32, 0.0 }
 0x232   : > { %1526 = vst [vmem:[#allocation1 + $0x1] ss:$4 sm:$0xff] %v1432_v47  ;;  %v1578_v57 = vadd.f32 %v1577_v52, %v1576_v12  ;;  %v1579_v9 = vsel %vm1275_vm7, %v1524_v42, 0.0 }
 0x233   : > { %1527 = vst [vmem:[#allocation1 + $0x2] ss:$4 sm:$0xff] %v1433_v48 }
 0x234   : > { %1528 = vst [vmem:[#allocation1 + $0x3] ss:$4 sm:$0xff] %v1434_v41  ;;  %v1580_v4 = vadd.f32 %v1579_v9, %v1578_v57 }
 0x235   : > { %1529 = vst [vmem:[#allocation1 + $0x20] ss:$4 sm:$0xff] %v1435_v54 }
 0x23b   : > { %v1530_v49 = vld.sshfl [vmem:[#allocation1] sm:$0xff pattern:$0x73625140] }
 0x23c   : > { %1532 = vst [vmem:[#allocation1] ss:$4 sm:$0xff] %v1436_v56  ;;  %v1531_v51 = vld.sshfl [vmem:[#allocation1 + $0x20] sm:$0xff pattern:$0x73625140]  ;;  %v1581_v63 = vsel %vm1273_vm6, %v1530_v49, 0.0 }
 0x23d   : > { %1533 = vst [vmem:[#allocation1 + $0x1] ss:$4 sm:$0xff] %v1437_v45  ;;  %v1582_v6 = vadd.f32 %v1581_v63, %v1580_v4  ;;  %v1583_v30 = vsel %vm1275_vm7, %v1531_v51, 0.0 }
 0x23e   : > { %1534 = vst [vmem:[#allocation1 + $0x2] ss:$4 sm:$0xff] %v1438_v0 }
 0x23f   : > { %1535 = vst [vmem:[#allocation1 + $0x3] ss:$4 sm:$0xff] %v1439_v62  ;;  %v1584_v53 = vadd.f32 %v1583_v30, %v1582_v6 }
 0x240   : > { %1536 = vst [vmem:[#allocation1 + $0x20] ss:$4 sm:$0xff] %v1440_v1 }
 0x246   : > { %v1537_v2 = vld.sshfl [vmem:[#allocation1] sm:$0xff pattern:$0x73625140] }
 0x247   : > { %1539 = vst [vmem:[#allocation1] ss:$4 sm:$0xff] %v1441_v16  ;;  %v1538_v14 = vld.sshfl [vmem:[#allocation1 + $0x20] sm:$0xff pattern:$0x73625140]  ;;  %v1585_v27 = vsel %vm1273_vm6, %v1537_v2, 0.0 }
 0x248   : > { %1540 = vst [vmem:[#allocation1 + $0x1] ss:$4 sm:$0xff] %v1442_v20  ;;  %v1586_v33 = vadd.f32 %v1585_v27, %v1584_v53  ;;  %v1587_v7 = vsel %vm1275_vm7, %v1538_v14, 0.0 }
 0x249   : > { %1541 = vst [vmem:[#allocation1 + $0x2] ss:$4 sm:$0xff] %v1443_v3 }
 0x24a   : > { %1542 = vst [vmem:[#allocation1 + $0x3] ss:$4 sm:$0xff] %v1444_v11  ;;  %v1588_v17 = vadd.f32 %v1587_v7, %v1586_v33 }
 0x24b   : > { %1543 = vst [vmem:[#allocation1 + $0x20] ss:$4 sm:$0xff] %v1445_v5 }
 0x251   : > { %v1544_v8 = vld.sshfl [vmem:[#allocation1] sm:$0xff pattern:$0x73625140] }
 0x252   : > { %v1545_v35 = vld.sshfl [vmem:[#allocation1 + $0x20] sm:$0xff pattern:$0x73625140]  ;;  %v1589_v19 = vsel %vm1273_vm6, %v1544_v8, 0.0 }
 0x253   : > { %v1590_v13 = vadd.f32 %v1589_v19, %v1588_v17  ;;  %v1591_v38 = vsel %vm1275_vm7, %v1545_v35, 0.0 }
 0x255   : > { %v1592_v18 = vadd.f32 %v1591_v38, %v1590_v13 }
 0x257   : > { %v1593_v24 = vrot.slane %v1592_v18, 4 }
 0x259   : > { %v1594_v15 = vadd.f32 %v1593_v24, %v1592_v18 }
 0x25b   : > { %v1595_v25 = vrot.slane %v1594_v15, 2 }
 0x25d   : > { %v1596_v29 = vadd.f32 %v1595_v25, %v1594_v15 }
 0x25f   : > { %v1597_v28 = vrot.slane %v1596_v29, 1 }
 0x261   : > { %v1598_v21 = vadd.f32 %v1597_v28, %v1596_v29 }
 0x263   : > { %1599 = vst.msk [vmem:[%s2367_s7 + $0x1] sm:$0x1] %vm1404_vm8, %v1598_v21 }
 0x264 PF: > { %s14_s14 = sadd.s32 1, %s1855_s14   ;;  %s2462_s12 = smov %s1851_s13 }
 0x265   : > { %p11_p6 = scmp.ge.s32.totalorder %s14_s14, 4   ;;  %s2463_s13 = smov %s2465_s15 }
 0x267   :  { %13 = sbr.rel (!%p11_p6) target bundleno = 2 (0x2), region = 108 }

</bundles_post_ra>
